<compile_context>
chip_gen: v7x
topology: tpu7x:2x2x1
jax: 0.10.0
libtpu: 0.0.40
codegen_flags: <defaults>
</compile_context>

<pallas_src>
import functools

import jax
import jax.numpy as jnp
import numpy as np
from jax.experimental import pallas as pl
from jax.experimental.pallas import tpu as pltpu


def _gru_kernel(sched_ref, x_ref, len_ref, wih_ref, gbias_ref, whh_ref,
                bhn_ref, out_ref, gi_ref, h_ref, *, time_chunk, unroll):
    """One grid step = (batch block b, time chunk c) of the GRU recurrence.

    sched_ref: SMEM (2,) int32   [last_active_chunk, max_len]
    x_ref    : [Tc*Bb, Ep]       embedded tokens, time-major within the chunk
    len_ref  : [Bb, 1] int32     sequence lengths
    wih_ref  : [Ep, G]           W_ih^T (resident), G = 3*Hp
    gbias_ref: [1, G]            folded biases (b_ih all gates + b_hh_{r,z})
    whh_ref  : [Hp, G]           W_hh^T (resident)
    bhn_ref  : [1, Hp]           b_hh of the n gate (stays inside r-product)
    out_ref  : [Bb, Hp]          final hidden state (written at last chunk)
    gi_ref   : VMEM scratch [Tc*Bb, G]   per-chunk input projection
    h_ref    : VMEM scratch [Bb, Hp]     hidden state carried across chunks
    """
    c = pl.program_id(1)
    Bb, Hp = h_ref.shape
    Tc = time_chunk
    t0 = c * Tc
    max_len = sched_ref[1]

    @pl.when(c == 0)
    def _():
        h_ref[...] = jnp.zeros_like(h_ref)

    @pl.when(t0 < max_len)           # skip chunks past the longest sequence
    def _():
        # ---- fused input projection: one big MXU matmul per chunk ----
        gi_ref[...] = (
            jnp.dot(x_ref[...], wih_ref[...],
                    preferred_element_type=jnp.float32) + gbias_ref[...])

        lens = len_ref[...]                              # [Bb, 1] int32
        whh = whh_ref[...]                               # [Hp, G]
        bhn = jnp.broadcast_to(bhn_ref[...], (Bb, Hp))   # hoisted broadcast

        def step(i, h):
            row0 = pl.multiple_of(i * Bb, Bb)
            gi = gi_ref[pl.ds(row0, Bb), :]              # [Bb, G]
            # TODO(synk): pltpu.matmul_push_rhs to hold W_hh in MXU weight
            # registers across the chunk instead of re-pushing each step.
            gh = jnp.dot(h, whh, preferred_element_type=jnp.float32)
            r = jax.nn.sigmoid(gi[:, :Hp] + gh[:, :Hp])
            z = jax.nn.sigmoid(gi[:, Hp:2 * Hp] + gh[:, Hp:2 * Hp])
            n = jnp.tanh(gi[:, 2 * Hp:] + r * (gh[:, 2 * Hp:] + bhn))
            h_new = n + z * (h - n)                      # == (1-z)*n + z*h
            # packed-sequence semantics: freeze h once t >= length[b]
            return jnp.where((t0 + i) < lens, h_new, h)

        h_ref[...] = jax.lax.fori_loop(0, Tc, step, h_ref[...], unroll=unroll)

    @pl.when(c == pl.num_programs(1) - 1)
    def _():
        out_ref[...] = h_ref[...]


def _gru_final_state_pallas(sched, x_flat, lens_p, w_ih_p, gi_bias, w_hh_p,
                            b_hh_n_p, *, time_chunk):
    """x_flat: [num_bb, Tp*Bb, Ep] f32, lens_p: [Bp,1] i32, w_ih_p: [Ep,G],
    gi_bias: [1,G], w_hh_p: [Hp,G], b_hh_n_p: [1,Hp]. Returns [Bp, Hp] f32."""
    num_bb, TB, Ep = x_flat.shape
    Bp = lens_p.shape[0]
    Hp, G = w_hh_p.shape
    Bb = Bp // num_bb
    Tc = time_chunk
    assert TB % (Tc * Bb) == 0
    num_chunks = TB // (Tc * Bb)

    unroll = min(Tc, 16 if Bb <= 16 else (8 if Bb <= 64 else 4))
    kernel = functools.partial(_gru_kernel, time_chunk=Tc, unroll=unroll)

    grid_spec = pltpu.PrefetchScalarGridSpec(
        num_scalar_prefetch=1,
        grid=(num_bb, num_chunks),
        in_specs=[
            # x chunk: clamp the time-block index so chunks past max_len
            # revisit the previous block and Pallas elides their DMA.
            pl.BlockSpec((None, Tc * Bb, Ep),
                         lambda b, c, s: (b, jnp.minimum(c, s[0]), 0)),
            pl.BlockSpec((Bb, 1), lambda b, c, s: (b, 0)),     # lengths
            pl.BlockSpec((Ep, G), lambda b, c, s: (0, 0)),     # W_ih (resident)
            pl.BlockSpec((1, G), lambda b, c, s: (0, 0)),      # folded biases
            pl.BlockSpec((Hp, G), lambda b, c, s: (0, 0)),     # W_hh (resident)
            pl.BlockSpec((1, Hp), lambda b, c, s: (0, 0)),     # b_hh_n
        ],
        out_specs=pl.BlockSpec((Bb, Hp), lambda b, c, s: (b, 0)),
        scratch_shapes=[
            pltpu.VMEM((Tc * Bb, G), jnp.float32),   # per-chunk gi
            pltpu.VMEM((Bb, Hp), jnp.float32),       # hidden-state carry
        ],
    )

    return pl.pallas_call(
        kernel,
        out_shape=jax.ShapeDtypeStruct((Bp, Hp), jnp.float32),
        grid_spec=grid_spec,
        compiler_params=pltpu.CompilerParams(
            dimension_semantics=("parallel", "arbitrary"),
            vmem_limit_bytes=32 * 1024 * 1024),
    )(sched, x_flat, lens_p, w_ih_p, gi_bias, w_hh_p, b_hh_n_p)


def instruction_encoder_forward(instruction_tokens, params, *,
                                max_time_chunk=256,
                                vmem_stream_budget=10 * 1024 * 1024):
    """InstructionEncoder.forward (GRU, final_state_only=True path).

    instruction_tokens: [B, T] int32 token ids (0 = PAD).
    Returns packed-sequence final hidden state [B, H] f32.
    """
    emb = params["embedding"]          # [vocab, E], row 0 == 0 (padding_idx)
    w_ih_t = params["w_ih_t"]          # [E, 3H]  (PyTorch weight_ih_l0^T)
    w_hh_t = params["w_hh_t"]          # [H, 3H]  (PyTorch weight_hh_l0^T)
    b_ih = params["b_ih"]              # [1, 3H]
    b_hh = params["b_hh"]              # [1, 3H]

    B, T = instruction_tokens.shape
    E = emb.shape[1]
    H = w_hh_t.shape[0]

    # lane/sublane-dense padding
    Hp = -(-H // 128) * 128
    Ep = -(-E // 8) * 8
    G = 3 * Hp

    # Batch blocking: one block for small batches (shortest serial chain on a
    # single TensorCore); 2 "parallel" blocks for large batches so v7x's
    # second TensorCore shares the recurrence.
    if B >= 128:
        Bp = -(-B // 16) * 16
        num_bb = 2
    else:
        Bp = -(-B // 8) * 8
        num_bb = 1
    Bb = Bp // num_bb

    # Time chunk from a VMEM byte budget: double-buffered x stream + gi
    # scratch (+ matmul intermediate), all f32.
    per_t_bytes = Bb * (2 * Ep + 2 * G) * 4
    Tc = int(max(1, min(max_time_chunk, vmem_stream_budget // per_t_bytes, T)))
    Tp = -(-T // Tc) * Tc

    # lengths = (instruction != 0).sum(dim=1)
    lengths = jnp.sum((instruction_tokens != 0).astype(jnp.int32), axis=1)   # [B]
    lens_p = jnp.pad(lengths, (0, Bp - B)).reshape(Bp, 1).astype(jnp.int32)  # [Bp,1]

    max_len = jnp.max(lengths).astype(jnp.int32)
    last_chunk = jnp.maximum((max_len + Tc - 1) // Tc - 1, 0)
    sched = jnp.stack([last_chunk, max_len]).astype(jnp.int32)   # SMEM prefetch

    # ---- gate-wise zero padding of weights / biases to Hp (per gate) ----
    def pad_gate_cols(w3h):  # [..., 3H] -> [..., 3Hp]
        gates = jnp.split(w3h, 3, axis=-1)
        pad = [(0, 0)] * (w3h.ndim - 1) + [(0, Hp - H)]
        return jnp.concatenate([jnp.pad(g, pad) for g in gates], axis=-1)

    w_ih_p = jnp.pad(pad_gate_cols(w_ih_t), ((0, Ep - E), (0, 0)))   # [Ep, G]
    w_hh_p = jnp.pad(pad_gate_cols(w_hh_t), ((0, Hp - H), (0, 0)))   # [Hp, G]

    b_ih_r, b_ih_z, b_ih_n = jnp.split(b_ih, 3, axis=-1)
    b_hh_r, b_hh_z, b_hh_n = jnp.split(b_hh, 3, axis=-1)
    pad_h = lambda v: jnp.pad(v, ((0, 0), (0, Hp - H)))
    # fold b_ih (all gates) + b_hh_{r,z} into the in-kernel input projection
    gi_bias = jnp.concatenate(
        [pad_h(b_ih_r + b_hh_r), pad_h(b_ih_z + b_hh_z), pad_h(b_ih_n)],
        axis=-1)                                                     # [1, G]
    b_hh_n_p = pad_h(b_hh_n)                                         # [1, Hp]

    # Embedding gather stays in XLA; present x to the kernel as
    # [num_bb, Tp*Bb, Ep], time-major within each batch block (row t*Bb + b of
    # a chunk is timestep t of batch row b). For num_bb == 1 the transpose is
    # a free reshape.
    x_tbe = jnp.take(emb, instruction_tokens.T, axis=0).astype(jnp.float32)  # [T,B,E]
    x_tbe = jnp.pad(x_tbe, ((0, Tp - T), (0, Bp - B), (0, Ep - E)))          # [Tp,Bp,Ep]
    x_flat = (x_tbe.reshape(Tp, num_bb, Bb, Ep)
                   .transpose(1, 0, 2, 3)
                   .reshape(num_bb, Tp * Bb, Ep))

    out_p = _gru_final_state_pallas(sched, x_flat, lens_p, w_ih_p, gi_bias,
                                    w_hh_p, b_hh_n_p, time_chunk=Tc)
    return out_p[:B, :H]


def _reference_forward(instruction_tokens, params):
    """Pure-numpy reference (packed-sequence GRU final-state semantics)."""
    emb = np.asarray(params["embedding"])
    w_ih_t = np.asarray(params["w_ih_t"])
    w_hh_t = np.asarray(params["w_hh_t"])
    b_ih = np.asarray(params["b_ih"])[0]
    b_hh = np.asarray(params["b_hh"])[0]
    toks = np.asarray(instruction_tokens)
    B, T = toks.shape
    H = w_hh_t.shape[0]
    lengths = (toks != 0).sum(axis=1)

    def sigmoid(v):
        return 1.0 / (1.0 + np.exp(-v))

    out = np.zeros((B, H), dtype=np.float32)
    for b in range(B):
        h = np.zeros((H,), dtype=np.float32)
        for t in range(int(lengths[b])):
            x = emb[toks[b, t]]
            gi = x @ w_ih_t + b_ih
            gh = h @ w_hh_t + b_hh
            r = sigmoid(gi[:H] + gh[:H])
            z = sigmoid(gi[H:2 * H] + gh[H:2 * H])
            n = np.tanh(gi[2 * H:] + r * gh[2 * H:])
            h = (1.0 - z) * n + z * h
        out[b] = h
    return out


if __name__ == "__main__":
    # small config
    B, T = 2, 8
    VOCAB = 20
    E = 32      # embedding_size
    H = 32      # hidden_size

    key = jax.random.PRNGKey(0)
    k_emb, k_wih, k_whh, k_bih, k_bhh, k_tok = jax.random.split(key, 6)

    # deterministic synthetic parameters
    embedding = 0.1 * jax.random.normal(k_emb, (VOCAB, E), dtype=jnp.float32)
    embedding = embedding.at[0].set(0.0)                         # padding_idx=0
    # PyTorch GRU stores weight_ih [3H, E] / weight_hh [3H, H]; we keep transposes.
    w_ih_t = 0.1 * jax.random.normal(k_wih, (E, 3 * H), dtype=jnp.float32)
    w_hh_t = 0.1 * jax.random.normal(k_whh, (H, 3 * H), dtype=jnp.float32)
    b_ih = 0.1 * jax.random.normal(k_bih, (1, 3 * H), dtype=jnp.float32)
    b_hh = 0.1 * jax.random.normal(k_bhh, (1, 3 * H), dtype=jnp.float32)

    params = {"embedding": embedding, "w_ih_t": w_ih_t, "w_hh_t": w_hh_t,
              "b_ih": b_ih, "b_hh": b_hh}

    # instruction tokens: non-zero prefix, zero (PAD) tail; lengths = [6, 4]
    toks = jax.random.randint(k_tok, (B, T), 1, VOCAB, dtype=jnp.int32)
    pad_mask = jnp.array(
        [[1, 1, 1, 1, 1, 1, 0, 0],
         [1, 1, 1, 1, 0, 0, 0, 0]], dtype=jnp.int32)
    instruction = toks * pad_mask                                # [B, T] int32

    fwd = jax.jit(functools.partial(instruction_encoder_forward, params=params))
    out = fwd(instruction)
    out = jax.block_until_ready(out)

    ref = _reference_forward(instruction, params)
    np.testing.assert_allclose(np.asarray(out), ref, rtol=1e-5, atol=1e-5)

    print("KERNEL_OK")

    # TODO(synk): LSTM / bidirectional / pretrained-embedding-file paths of the
    # original module are not implemented (config fixed to GRU, unidirectional,
    # final_state_only=True, learned embeddings).
</pallas_src>

<mosaic_0001>
module attributes {stable_mosaic.version = 11 : i64} {
  func.func @_gru_kernel(%arg0: i32, %arg1: i32, %arg2: memref<2xi32, #tpu.memory_space<smem>>, %arg3: memref<1x64x32xf32, #tpu.memory_space<vmem>>, %arg4: memref<8x1xi32, #tpu.memory_space<vmem>>, %arg5: memref<32x384xf32, #tpu.memory_space<vmem>>, %arg6: memref<1x384xf32, #tpu.memory_space<vmem>>, %arg7: memref<128x384xf32, #tpu.memory_space<vmem>>, %arg8: memref<1x128xf32, #tpu.memory_space<vmem>>, %arg9: memref<8x128xf32, #tpu.memory_space<vmem>>, %arg10: memref<64x384xf32, #tpu.memory_space<vmem>>, %arg11: memref<8x128xf32, #tpu.memory_space<vmem>>) attributes {dimension_semantics = [#tpu.dimension_semantics<parallel>, #tpu.dimension_semantics<arbitrary>], iteration_bounds = array<i64: 1, 1>, scalar_prefetch = 1 : i64, scratch_operands = 2 : i64, tpu.core_type = #tpu.core_type<tc>, window_params = [{transform_indices = @transform_0, window_bounds = array<i64: 1, 64, 32>}, {transform_indices = @transform_1, window_bounds = array<i64: 8, 1>}, {pipeline_mode = #tpu.pipeline_mode<synchronous>, transform_indices = @transform_2, window_bounds = array<i64: 32, 384>}, {pipeline_mode = #tpu.pipeline_mode<synchronous>, transform_indices = @transform_3, window_bounds = array<i64: 1, 384>}, {pipeline_mode = #tpu.pipeline_mode<synchronous>, transform_indices = @transform_4, window_bounds = array<i64: 128, 384>}, {pipeline_mode = #tpu.pipeline_mode<synchronous>, transform_indices = @transform_5, window_bounds = array<i64: 1, 128>}, {transform_indices = @transform_6, window_bounds = array<i64: 8, 128>}]} {
    %c8_i32 = arith.constant 8 : i32
    %0 = arith.muli %arg1, %c8_i32 : i32
    %c1 = arith.constant 1 : index
    %1 = memref.load %arg2[%c1] : memref<2xi32, #tpu.memory_space<smem>>
    %c0_i32 = arith.constant 0 : i32
    %2 = arith.cmpi eq, %arg1, %c0_i32 : i32
    %3 = arith.extui %2 : i1 to i32
    %c0_i32_0 = arith.constant 0 : i32
    %4 = arith.cmpi ne, %3, %c0_i32_0 : i32
    scf.if %4 {
      %cst = arith.constant 0.000000e+00 : f32
      %11 = vector.broadcast %cst : f32 to vector<8x128xf32>
      %c0 = arith.constant 0 : index
      %c0_4 = arith.constant 0 : index
      %12 = vector.load %arg11[%c0, %c0_4] : memref<8x128xf32, #tpu.memory_space<vmem>>, vector<8x128xf32>
      tpu.vector_store %arg11[%c0, %c0_4], %11 {strides = array<i32>} : memref<8x128xf32, #tpu.memory_space<vmem>>, vector<8x128xf32>,
    } else {
    }
    %5 = arith.cmpi slt, %0, %1 : i32
    %6 = arith.extui %5 : i1 to i32
    %c0_i32_1 = arith.constant 0 : i32
    %7 = arith.cmpi ne, %6, %c0_i32_1 : i32
    scf.if %7 {
      %c0 = arith.constant 0 : index
      %c0_4 = arith.constant 0 : index
      %c0_5 = arith.constant 0 : index
      %11 = vector.load %arg3[%c0, %c0_4, %c0_5] : memref<1x64x32xf32, #tpu.memory_space<vmem>>, vector<1x64x32xf32>
      %12 = vector.shape_cast %11 : vector<1x64x32xf32> to vector<64x32xf32>
      %c0_6 = arith.constant 0 : index
      %c0_7 = arith.constant 0 : index
      %13 = vector.load %arg5[%c0_6, %c0_7] : memref<32x384xf32, #tpu.memory_space<vmem>>, vector<32x384xf32>
      %cst = arith.constant dense<0.000000e+00> : vector<64x384xf32>
      %14 = tpu.matmul %12, %13, %cst {dimension_numbers = #tpu.dot_dimension_numbers<[1], [0], [0], [1], [0, 0, 1, 1], [], []>} : vector<64x32xf32>, vector<32x384xf32>, vector<64x384xf32> -> vector<64x384xf32>
      %c0_8 = arith.constant 0 : index
      %c0_9 = arith.constant 0 : index
      %15 = vector.load %arg6[%c0_8, %c0_9] : memref<1x384xf32, #tpu.memory_space<vmem>>, vector<1x384xf32>
      %16 = vector.broadcast %15 : vector<1x384xf32> to vector<64x384xf32>
      %17 = arith.addf %14, %16 : vector<64x384xf32>
      %c0_10 = arith.constant 0 : index
      %c0_11 = arith.constant 0 : index
      %18 = vector.load %arg10[%c0_10, %c0_11] : memref<64x384xf32, #tpu.memory_space<vmem>>, vector<64x384xf32>
      tpu.vector_store %arg10[%c0_10, %c0_11], %17 {strides = array<i32>} : memref<64x384xf32, #tpu.memory_space<vmem>>, vector<64x384xf32>,
      %c0_12 = arith.constant 0 : index
      %c0_13 = arith.constant 0 : index
      %19 = vector.load %arg4[%c0_12, %c0_13] : memref<8x1xi32, #tpu.memory_space<vmem>>, vector<8x1xi32>
      %c0_14 = arith.constant 0 : index
      %c0_15 = arith.constant 0 : index
      %20 = vector.load %arg7[%c0_14, %c0_15] : memref<128x384xf32, #tpu.memory_space<vmem>>, vector<128x384xf32>
      %c0_16 = arith.constant 0 : index
      %c0_17 = arith.constant 0 : index
      %21 = vector.load %arg8[%c0_16, %c0_17] : memref<1x128xf32, #tpu.memory_space<vmem>>, vector<1x128xf32>
      %22 = vector.shape_cast %21 : vector<1x128xf32> to vector<1x128xf32>
      %23 = vector.broadcast %22 : vector<1x128xf32> to vector<8x128xf32>
      %c0_18 = arith.constant 0 : index
      %c0_19 = arith.constant 0 : index
      %24 = vector.load %arg11[%c0_18, %c0_19] : memref<8x128xf32, #tpu.memory_space<vmem>>, vector<8x128xf32>
      %c0_i32_20 = arith.constant 0 : i32
      %c8_i32_21 = arith.constant 8 : i32
      %25 = arith.muli %c0_i32_20, %c8_i32_21 : i32
      %26 = tpu.assume_multiple %25, 8 : i32
      %27 = arith.index_cast %26 : i32 to index
      %c0_22 = arith.constant 0 : index
      %28 = vector.load %arg10[%27, %c0_22] : memref<64x384xf32, #tpu.memory_space<vmem>>, vector<8x384xf32>
      %cst_23 = arith.constant dense<0.000000e+00> : vector<8x384xf32>
      %29 = tpu.matmul %24, %20, %cst_23 {dimension_numbers = #tpu.dot_dimension_numbers<[1], [0], [0], [1], [0, 0, 1, 1], [], []>} : vector<8x128xf32>, vector<128x384xf32>, vector<8x384xf32> -> vector<8x384xf32>
      %30 = vector.extract_strided_slice %28 {offsets = [0, 0], sizes = [8, 128], strides = [1, 1]} : vector<8x384xf32> to vector<8x128xf32>
      %31 = vector.extract_strided_slice %29 {offsets = [0, 0], sizes = [8, 128], strides = [1, 1]} : vector<8x384xf32> to vector<8x128xf32>
      %32 = arith.addf %30, %31 : vector<8x128xf32>
      %33 = arith.negf %32 : vector<8x128xf32>
      %34 = math.exp %33 : vector<8x128xf32>
      %cst_24 = arith.constant 1.000000e+00 : f32
      %35 = vector.broadcast %cst_24 : f32 to vector<8x128xf32>
      %36 = arith.addf %35, %34 : vector<8x128xf32>
      %37 = arith.divf %35, %36 : vector<8x128xf32>
      %38 = vector.extract_strided_slice %28 {offsets = [0, 128], sizes = [8, 128], strides = [1, 1]} : vector<8x384xf32> to vector<8x128xf32>
      %39 = vector.extract_strided_slice %29 {offsets = [0, 128], sizes = [8, 128], strides = [1, 1]} : vector<8x384xf32> to vector<8x128xf32>
      %40 = arith.addf %38, %39 : vector<8x128xf32>
      %41 = arith.negf %40 : vector<8x128xf32>
      %42 = math.exp %41 : vector<8x128xf32>
      %cst_25 = arith.constant 1.000000e+00 : f32
      %43 = vector.broadcast %cst_25 : f32 to vector<8x128xf32>
      %44 = arith.addf %43, %42 : vector<8x128xf32>
      %45 = arith.divf %43, %44 : vector<8x128xf32>
      %46 = vector.extract_strided_slice %28 {offsets = [0, 256], sizes = [8, 128], strides = [1, 1]} : vector<8x384xf32> to vector<8x128xf32>
      %47 = vector.extract_strided_slice %29 {offsets = [0, 256], sizes = [8, 128], strides = [1, 1]} : vector<8x384xf32> to vector<8x128xf32>
      %48 = arith.addf %47, %23 : vector<8x128xf32>
      %49 = arith.mulf %37, %48 : vector<8x128xf32>
      %50 = arith.addf %46, %49 : vector<8x128xf32>
      %51 = math.tanh %50 : vector<8x128xf32>
      %52 = arith.subf %24, %51 : vector<8x128xf32>
      %53 = arith.mulf %45, %52 : vector<8x128xf32>
      %54 = arith.addf %51, %53 : vector<8x128xf32>
      %55 = arith.addi %0, %c0_i32_20 : i32
      %56 = vector.broadcast %55 : i32 to vector<8x1xi32>
      %57 = arith.cmpi slt, %56, %19 : vector<8x1xi32>
      %58 = vector.shape_cast %57 : vector<8x1xi1> to vector<8x1xi1>
      %59 = vector.broadcast %58 : vector<8x1xi1> to vector<8x128xi1>
      %60 = arith.select %59, %54, %24 : vector<8x128xi1>, vector<8x128xf32>
      %c1_i32 = arith.constant 1 : i32
      %c8_i32_26 = arith.constant 8 : i32
      %61 = arith.muli %c1_i32, %c8_i32_26 : i32
      %62 = tpu.assume_multiple %61, 8 : i32
      %63 = arith.index_cast %62 : i32 to index
      %c0_27 = arith.constant 0 : index
      %64 = vector.load %arg10[%63, %c0_27] : memref<64x384xf32, #tpu.memory_space<vmem>>, vector<8x384xf32>
      %cst_28 = arith.constant dense<0.000000e+00> : vector<8x384xf32>
      %65 = tpu.matmul %60, %20, %cst_28 {dimension_numbers = #tpu.dot_dimension_numbers<[1], [0], [0], [1], [0, 0, 1, 1], [], []>} : vector<8x128xf32>, vector<128x384xf32>, vector<8x384xf32> -> vector<8x384xf32>
      %66 = vector.extract_strided_slice %64 {offsets = [0, 0], sizes = [8, 128], strides = [1, 1]} : vector<8x384xf32> to vector<8x128xf32>
      %67 = vector.extract_strided_slice %65 {offsets = [0, 0], sizes = [8, 128], strides = [1, 1]} : vector<8x384xf32> to vector<8x128xf32>
      %68 = arith.addf %66, %67 : vector<8x128xf32>
      %69 = arith.negf %68 : vector<8x128xf32>
      %70 = math.exp %69 : vector<8x128xf32>
      %cst_29 = arith.constant 1.000000e+00 : f32
      %71 = vector.broadcast %cst_29 : f32 to vector<8x128xf32>
      %72 = arith.addf %71, %70 : vector<8x128xf32>
      %73 = arith.divf %71, %72 : vector<8x128xf32>
      %74 = vector.extract_strided_slice %64 {offsets = [0, 128], sizes = [8, 128], strides = [1, 1]} : vector<8x384xf32> to vector<8x128xf32>
      %75 = vector.extract_strided_slice %65 {offsets = [0, 128], sizes = [8, 128], strides = [1, 1]} : vector<8x384xf32> to vector<8x128xf32>
      %76 = arith.addf %74, %75 : vector<8x128xf32>
      %77 = arith.negf %76 : vector<8x128xf32>
      %78 = math.exp %77 : vector<8x128xf32>
      %cst_30 = arith.constant 1.000000e+00 : f32
      %79 = vector.broadcast %cst_30 : f32 to vector<8x128xf32>
      %80 = arith.addf %79, %78 : vector<8x128xf32>
      %81 = arith.divf %79, %80 : vector<8x128xf32>
      %82 = vector.extract_strided_slice %64 {offsets = [0, 256], sizes = [8, 128], strides = [1, 1]} : vector<8x384xf32> to vector<8x128xf32>
      %83 = vector.extract_strided_slice %65 {offsets = [0, 256], sizes = [8, 128], strides = [1, 1]} : vector<8x384xf32> to vector<8x128xf32>
      %84 = arith.addf %83, %23 : vector<8x128xf32>
      %85 = arith.mulf %73, %84 : vector<8x128xf32>
      %86 = arith.addf %82, %85 : vector<8x128xf32>
      %87 = math.tanh %86 : vector<8x128xf32>
      %88 = arith.subf %60, %87 : vector<8x128xf32>
      %89 = arith.mulf %81, %88 : vector<8x128xf32>
      %90 = arith.addf %87, %89 : vector<8x128xf32>
      %91 = arith.addi %0, %c1_i32 : i32
      %92 = vector.broadcast %91 : i32 to vector<8x1xi32>
      %93 = arith.cmpi slt, %92, %19 : vector<8x1xi32>
      %94 = vector.shape_cast %93 : vector<8x1xi1> to vector<8x1xi1>
      %95 = vector.broadcast %94 : vector<8x1xi1> to vector<8x128xi1>
      %96 = arith.select %95, %90, %60 : vector<8x128xi1>, vector<8x128xf32>
      %c2_i32 = arith.constant 2 : i32
      %c8_i32_31 = arith.constant 8 : i32
      %97 = arith.muli %c2_i32, %c8_i32_31 : i32
      %98 = tpu.assume_multiple %97, 8 : i32
      %99 = arith.index_cast %98 : i32 to index
      %c0_32 = arith.constant 0 : index
      %100 = vector.load %arg10[%99, %c0_32] : memref<64x384xf32, #tpu.memory_space<vmem>>, vector<8x384xf32>
      %cst_33 = arith.constant dense<0.000000e+00> : vector<8x384xf32>
      %101 = tpu.matmul %96, %20, %cst_33 {dimension_numbers = #tpu.dot_dimension_numbers<[1], [0], [0], [1], [0, 0, 1, 1], [], []>} : vector<8x128xf32>, vector<128x384xf32>, vector<8x384xf32> -> vector<8x384xf32>
      %102 = vector.extract_strided_slice %100 {offsets = [0, 0], sizes = [8, 128], strides = [1, 1]} : vector<8x384xf32> to vector<8x128xf32>
      %103 = vector.extract_strided_slice %101 {offsets = [0, 0], sizes = [8, 128], strides = [1, 1]} : vector<8x384xf32> to vector<8x128xf32>
      %104 = arith.addf %102, %103 : vector<8x128xf32>
      %105 = arith.negf %104 : vector<8x128xf32>
      %106 = math.exp %105 : vector<8x128xf32>
      %cst_34 = arith.constant 1.000000e+00 : f32
      %107 = vector.broadcast %cst_34 : f32 to vector<8x128xf32>
      %108 = arith.addf %107, %106 : vector<8x128xf32>
      %109 = arith.divf %107, %108 : vector<8x128xf32>
      %110 = vector.extract_strided_slice %100 {offsets = [0, 128], sizes = [8, 128], strides = [1, 1]} : vector<8x384xf32> to vector<8x128xf32>
      %111 = vector.extract_strided_slice %101 {offsets = [0, 128], sizes = [8, 128], strides = [1, 1]} : vector<8x384xf32> to vector<8x128xf32>
      %112 = arith.addf %110, %111 : vector<8x128xf32>
      %113 = arith.negf %112 : vector<8x128xf32>
      %114 = math.exp %113 : vector<8x128xf32>
      %cst_35 = arith.constant 1.000000e+00 : f32
      %115 = vector.broadcast %cst_35 : f32 to vector<8x128xf32>
      %116 = arith.addf %115, %114 : vector<8x128xf32>
      %117 = arith.divf %115, %116 : vector<8x128xf32>
      %118 = vector.extract_strided_slice %100 {offsets = [0, 256], sizes = [8, 128], strides = [1, 1]} : vector<8x384xf32> to vector<8x128xf32>
      %119 = vector.extract_strided_slice %101 {offsets = [0, 256], sizes = [8, 128], strides = [1, 1]} : vector<8x384xf32> to vector<8x128xf32>
      %120 = arith.addf %119, %23 : vector<8x128xf32>
      %121 = arith.mulf %109, %120 : vector<8x128xf32>
      %122 = arith.addf %118, %121 : vector<8x128xf32>
      %123 = math.tanh %122 : vector<8x128xf32>
      %124 = arith.subf %96, %123 : vector<8x128xf32>
      %125 = arith.mulf %117, %124 : vector<8x128xf32>
      %126 = arith.addf %123, %125 : vector<8x128xf32>
      %127 = arith.addi %0, %c2_i32 : i32
      %128 = vector.broadcast %127 : i32 to vector<8x1xi32>
      %129 = arith.cmpi slt, %128, %19 : vector<8x1xi32>
      %130 = vector.shape_cast %129 : vector<8x1xi1> to vector<8x1xi1>
      %131 = vector.broadcast %130 : vector<8x1xi1> to vector<8x128xi1>
      %132 = arith.select %131, %126, %96 : vector<8x128xi1>, vector<8x128xf32>
      %c3_i32 = arith.constant 3 : i32
      %c8_i32_36 = arith.constant 8 : i32
      %133 = arith.muli %c3_i32, %c8_i32_36 : i32
      %134 = tpu.assume_multiple %133, 8 : i32
      %135 = arith.index_cast %134 : i32 to index
      %c0_37 = arith.constant 0 : index
      %136 = vector.load %arg10[%135, %c0_37] : memref<64x384xf32, #tpu.memory_space<vmem>>, vector<8x384xf32>
      %cst_38 = arith.constant dense<0.000000e+00> : vector<8x384xf32>
      %137 = tpu.matmul %132, %20, %cst_38 {dimension_numbers = #tpu.dot_dimension_numbers<[1], [0], [0], [1], [0, 0, 1, 1], [], []>} : vector<8x128xf32>, vector<128x384xf32>, vector<8x384xf32> -> vector<8x384xf32>
      %138 = vector.extract_strided_slice %136 {offsets = [0, 0], sizes = [8, 128], strides = [1, 1]} : vector<8x384xf32> to vector<8x128xf32>
      %139 = vector.extract_strided_slice %137 {offsets = [0, 0], sizes = [8, 128], strides = [1, 1]} : vector<8x384xf32> to vector<8x128xf32>
      %140 = arith.addf %138, %139 : vector<8x128xf32>
      %141 = arith.negf %140 : vector<8x128xf32>
      %142 = math.exp %141 : vector<8x128xf32>
      %cst_39 = arith.constant 1.000000e+00 : f32
      %143 = vector.broadcast %cst_39 : f32 to vector<8x128xf32>
      %144 = arith.addf %143, %142 : vector<8x128xf32>
      %145 = arith.divf %143, %144 : vector<8x128xf32>
      %146 = vector.extract_strided_slice %136 {offsets = [0, 128], sizes = [8, 128], strides = [1, 1]} : vector<8x384xf32> to vector<8x128xf32>
      %147 = vector.extract_strided_slice %137 {offsets = [0, 128], sizes = [8, 128], strides = [1, 1]} : vector<8x384xf32> to vector<8x128xf32>
      %148 = arith.addf %146, %147 : vector<8x128xf32>
      %149 = arith.negf %148 : vector<8x128xf32>
      %150 = math.exp %149 : vector<8x128xf32>
      %cst_40 = arith.constant 1.000000e+00 : f32
      %151 = vector.broadcast %cst_40 : f32 to vector<8x128xf32>
      %152 = arith.addf %151, %150 : vector<8x128xf32>
      %153 = arith.divf %151, %152 : vector<8x128xf32>
      %154 = vector.extract_strided_slice %136 {offsets = [0, 256], sizes = [8, 128], strides = [1, 1]} : vector<8x384xf32> to vector<8x128xf32>
      %155 = vector.extract_strided_slice %137 {offsets = [0, 256], sizes = [8, 128], strides = [1, 1]} : vector<8x384xf32> to vector<8x128xf32>
      %156 = arith.addf %155, %23 : vector<8x128xf32>
      %157 = arith.mulf %145, %156 : vector<8x128xf32>
      %158 = arith.addf %154, %157 : vector<8x128xf32>
      %159 = math.tanh %158 : vector<8x128xf32>
      %160 = arith.subf %132, %159 : vector<8x128xf32>
      %161 = arith.mulf %153, %160 : vector<8x128xf32>
      %162 = arith.addf %159, %161 : vector<8x128xf32>
      %163 = arith.addi %0, %c3_i32 : i32
      %164 = vector.broadcast %163 : i32 to vector<8x1xi32>
      %165 = arith.cmpi slt, %164, %19 : vector<8x1xi32>
      %166 = vector.shape_cast %165 : vector<8x1xi1> to vector<8x1xi1>
      %167 = vector.broadcast %166 : vector<8x1xi1> to vector<8x128xi1>
      %168 = arith.select %167, %162, %132 : vector<8x128xi1>, vector<8x128xf32>
      %c4_i32 = arith.constant 4 : i32
      %c8_i32_41 = arith.constant 8 : i32
      %169 = arith.muli %c4_i32, %c8_i32_41 : i32
      %170 = tpu.assume_multiple %169, 8 : i32
      %171 = arith.index_cast %170 : i32 to index
      %c0_42 = arith.constant 0 : index
      %172 = vector.load %arg10[%171, %c0_42] : memref<64x384xf32, #tpu.memory_space<vmem>>, vector<8x384xf32>
      %cst_43 = arith.constant dense<0.000000e+00> : vector<8x384xf32>
      %173 = tpu.matmul %168, %20, %cst_43 {dimension_numbers = #tpu.dot_dimension_numbers<[1], [0], [0], [1], [0, 0, 1, 1], [], []>} : vector<8x128xf32>, vector<128x384xf32>, vector<8x384xf32> -> vector<8x384xf32>
      %174 = vector.extract_strided_slice %172 {offsets = [0, 0], sizes = [8, 128], strides = [1, 1]} : vector<8x384xf32> to vector<8x128xf32>
      %175 = vector.extract_strided_slice %173 {offsets = [0, 0], sizes = [8, 128], strides = [1, 1]} : vector<8x384xf32> to vector<8x128xf32>
      %176 = arith.addf %174, %175 : vector<8x128xf32>
      %177 = arith.negf %176 : vector<8x128xf32>
      %178 = math.exp %177 : vector<8x128xf32>
      %cst_44 = arith.constant 1.000000e+00 : f32
      %179 = vector.broadcast %cst_44 : f32 to vector<8x128xf32>
      %180 = arith.addf %179, %178 : vector<8x128xf32>
      %181 = arith.divf %179, %180 : vector<8x128xf32>
      %182 = vector.extract_strided_slice %172 {offsets = [0, 128], sizes = [8, 128], strides = [1, 1]} : vector<8x384xf32> to vector<8x128xf32>
      %183 = vector.extract_strided_slice %173 {offsets = [0, 128], sizes = [8, 128], strides = [1, 1]} : vector<8x384xf32> to vector<8x128xf32>
      %184 = arith.addf %182, %183 : vector<8x128xf32>
      %185 = arith.negf %184 : vector<8x128xf32>
      %186 = math.exp %185 : vector<8x128xf32>
      %cst_45 = arith.constant 1.000000e+00 : f32
      %187 = vector.broadcast %cst_45 : f32 to vector<8x128xf32>
      %188 = arith.addf %187, %186 : vector<8x128xf32>
      %189 = arith.divf %187, %188 : vector<8x128xf32>
      %190 = vector.extract_strided_slice %172 {offsets = [0, 256], sizes = [8, 128], strides = [1, 1]} : vector<8x384xf32> to vector<8x128xf32>
      %191 = vector.extract_strided_slice %173 {offsets = [0, 256], sizes = [8, 128], strides = [1, 1]} : vector<8x384xf32> to vector<8x128xf32>
      %192 = arith.addf %191, %23 : vector<8x128xf32>
      %193 = arith.mulf %181, %192 : vector<8x128xf32>
      %194 = arith.addf %190, %193 : vector<8x128xf32>
      %195 = math.tanh %194 : vector<8x128xf32>
      %196 = arith.subf %168, %195 : vector<8x128xf32>
      %197 = arith.mulf %189, %196 : vector<8x128xf32>
      %198 = arith.addf %195, %197 : vector<8x128xf32>
      %199 = arith.addi %0, %c4_i32 : i32
      %200 = vector.broadcast %199 : i32 to vector<8x1xi32>
      %201 = arith.cmpi slt, %200, %19 : vector<8x1xi32>
      %202 = vector.shape_cast %201 : vector<8x1xi1> to vector<8x1xi1>
      %203 = vector.broadcast %202 : vector<8x1xi1> to vector<8x128xi1>
      %204 = arith.select %203, %198, %168 : vector<8x128xi1>, vector<8x128xf32>
      %c5_i32 = arith.constant 5 : i32
      %c8_i32_46 = arith.constant 8 : i32
      %205 = arith.muli %c5_i32, %c8_i32_46 : i32
      %206 = tpu.assume_multiple %205, 8 : i32
      %207 = arith.index_cast %206 : i32 to index
      %c0_47 = arith.constant 0 : index
      %208 = vector.load %arg10[%207, %c0_47] : memref<64x384xf32, #tpu.memory_space<vmem>>, vector<8x384xf32>
      %cst_48 = arith.constant dense<0.000000e+00> : vector<8x384xf32>
      %209 = tpu.matmul %204, %20, %cst_48 {dimension_numbers = #tpu.dot_dimension_numbers<[1], [0], [0], [1], [0, 0, 1, 1], [], []>} : vector<8x128xf32>, vector<128x384xf32>, vector<8x384xf32> -> vector<8x384xf32>
      %210 = vector.extract_strided_slice %208 {offsets = [0, 0], sizes = [8, 128], strides = [1, 1]} : vector<8x384xf32> to vector<8x128xf32>
      %211 = vector.extract_strided_slice %209 {offsets = [0, 0], sizes = [8, 128], strides = [1, 1]} : vector<8x384xf32> to vector<8x128xf32>
      %212 = arith.addf %210, %211 : vector<8x128xf32>
      %213 = arith.negf %212 : vector<8x128xf32>
      %214 = math.exp %213 : vector<8x128xf32>
      %cst_49 = arith.constant 1.000000e+00 : f32
      %215 = vector.broadcast %cst_49 : f32 to vector<8x128xf32>
      %216 = arith.addf %215, %214 : vector<8x128xf32>
      %217 = arith.divf %215, %216 : vector<8x128xf32>
      %218 = vector.extract_strided_slice %208 {offsets = [0, 128], sizes = [8, 128], strides = [1, 1]} : vector<8x384xf32> to vector<8x128xf32>
      %219 = vector.extract_strided_slice %209 {offsets = [0, 128], sizes = [8, 128], strides = [1, 1]} : vector<8x384xf32> to vector<8x128xf32>
      %220 = arith.addf %218, %219 : vector<8x128xf32>
      %221 = arith.negf %220 : vector<8x128xf32>
      %222 = math.exp %221 : vector<8x128xf32>
      %cst_50 = arith.constant 1.000000e+00 : f32
      %223 = vector.broadcast %cst_50 : f32 to vector<8x128xf32>
      %224 = arith.addf %223, %222 : vector<8x128xf32>
      %225 = arith.divf %223, %224 : vector<8x128xf32>
      %226 = vector.extract_strided_slice %208 {offsets = [0, 256], sizes = [8, 128], strides = [1, 1]} : vector<8x384xf32> to vector<8x128xf32>
      %227 = vector.extract_strided_slice %209 {offsets = [0, 256], sizes = [8, 128], strides = [1, 1]} : vector<8x384xf32> to vector<8x128xf32>
      %228 = arith.addf %227, %23 : vector<8x128xf32>
      %229 = arith.mulf %217, %228 : vector<8x128xf32>
      %230 = arith.addf %226, %229 : vector<8x128xf32>
      %231 = math.tanh %230 : vector<8x128xf32>
      %232 = arith.subf %204, %231 : vector<8x128xf32>
      %233 = arith.mulf %225, %232 : vector<8x128xf32>
      %234 = arith.addf %231, %233 : vector<8x128xf32>
      %235 = arith.addi %0, %c5_i32 : i32
      %236 = vector.broadcast %235 : i32 to vector<8x1xi32>
      %237 = arith.cmpi slt, %236, %19 : vector<8x1xi32>
      %238 = vector.shape_cast %237 : vector<8x1xi1> to vector<8x1xi1>
      %239 = vector.broadcast %238 : vector<8x1xi1> to vector<8x128xi1>
      %240 = arith.select %239, %234, %204 : vector<8x128xi1>, vector<8x128xf32>
      %c6_i32 = arith.constant 6 : i32
      %c8_i32_51 = arith.constant 8 : i32
      %241 = arith.muli %c6_i32, %c8_i32_51 : i32
      %242 = tpu.assume_multiple %241, 8 : i32
      %243 = arith.index_cast %242 : i32 to index
      %c0_52 = arith.constant 0 : index
      %244 = vector.load %arg10[%243, %c0_52] : memref<64x384xf32, #tpu.memory_space<vmem>>, vector<8x384xf32>
      %cst_53 = arith.constant dense<0.000000e+00> : vector<8x384xf32>
      %245 = tpu.matmul %240, %20, %cst_53 {dimension_numbers = #tpu.dot_dimension_numbers<[1], [0], [0], [1], [0, 0, 1, 1], [], []>} : vector<8x128xf32>, vector<128x384xf32>, vector<8x384xf32> -> vector<8x384xf32>
      %246 = vector.extract_strided_slice %244 {offsets = [0, 0], sizes = [8, 128], strides = [1, 1]} : vector<8x384xf32> to vector<8x128xf32>
      %247 = vector.extract_strided_slice %245 {offsets = [0, 0], sizes = [8, 128], strides = [1, 1]} : vector<8x384xf32> to vector<8x128xf32>
      %248 = arith.addf %246, %247 : vector<8x128xf32>
      %249 = arith.negf %248 : vector<8x128xf32>
      %250 = math.exp %249 : vector<8x128xf32>
      %cst_54 = arith.constant 1.000000e+00 : f32
      %251 = vector.broadcast %cst_54 : f32 to vector<8x128xf32>
      %252 = arith.addf %251, %250 : vector<8x128xf32>
      %253 = arith.divf %251, %252 : vector<8x128xf32>
      %254 = vector.extract_strided_slice %244 {offsets = [0, 128], sizes = [8, 128], strides = [1, 1]} : vector<8x384xf32> to vector<8x128xf32>
      %255 = vector.extract_strided_slice %245 {offsets = [0, 128], sizes = [8, 128], strides = [1, 1]} : vector<8x384xf32> to vector<8x128xf32>
      %256 = arith.addf %254, %255 : vector<8x128xf32>
      %257 = arith.negf %256 : vector<8x128xf32>
      %258 = math.exp %257 : vector<8x128xf32>
      %cst_55 = arith.constant 1.000000e+00 : f32
      %259 = vector.broadcast %cst_55 : f32 to vector<8x128xf32>
      %260 = arith.addf %259, %258 : vector<8x128xf32>
      %261 = arith.divf %259, %260 : vector<8x128xf32>
      %262 = vector.extract_strided_slice %244 {offsets = [0, 256], sizes = [8, 128], strides = [1, 1]} : vector<8x384xf32> to vector<8x128xf32>
      %263 = vector.extract_strided_slice %245 {offsets = [0, 256], sizes = [8, 128], strides = [1, 1]} : vector<8x384xf32> to vector<8x128xf32>
      %264 = arith.addf %263, %23 : vector<8x128xf32>
      %265 = arith.mulf %253, %264 : vector<8x128xf32>
      %266 = arith.addf %262, %265 : vector<8x128xf32>
      %267 = math.tanh %266 : vector<8x128xf32>
      %268 = arith.subf %240, %267 : vector<8x128xf32>
      %269 = arith.mulf %261, %268 : vector<8x128xf32>
      %270 = arith.addf %267, %269 : vector<8x128xf32>
      %271 = arith.addi %0, %c6_i32 : i32
      %272 = vector.broadcast %271 : i32 to vector<8x1xi32>
      %273 = arith.cmpi slt, %272, %19 : vector<8x1xi32>
      %274 = vector.shape_cast %273 : vector<8x1xi1> to vector<8x1xi1>
      %275 = vector.broadcast %274 : vector<8x1xi1> to vector<8x128xi1>
      %276 = arith.select %275, %270, %240 : vector<8x128xi1>, vector<8x128xf32>
      %c7_i32 = arith.constant 7 : i32
      %c8_i32_56 = arith.constant 8 : i32
      %277 = arith.muli %c7_i32, %c8_i32_56 : i32
      %278 = tpu.assume_multiple %277, 8 : i32
      %279 = arith.index_cast %278 : i32 to index
      %c0_57 = arith.constant 0 : index
      %280 = vector.load %arg10[%279, %c0_57] : memref<64x384xf32, #tpu.memory_space<vmem>>, vector<8x384xf32>
      %cst_58 = arith.constant dense<0.000000e+00> : vector<8x384xf32>
      %281 = tpu.matmul %276, %20, %cst_58 {dimension_numbers = #tpu.dot_dimension_numbers<[1], [0], [0], [1], [0, 0, 1, 1], [], []>} : vector<8x128xf32>, vector<128x384xf32>, vector<8x384xf32> -> vector<8x384xf32>
      %282 = vector.extract_strided_slice %280 {offsets = [0, 0], sizes = [8, 128], strides = [1, 1]} : vector<8x384xf32> to vector<8x128xf32>
      %283 = vector.extract_strided_slice %281 {offsets = [0, 0], sizes = [8, 128], strides = [1, 1]} : vector<8x384xf32> to vector<8x128xf32>
      %284 = arith.addf %282, %283 : vector<8x128xf32>
      %285 = arith.negf %284 : vector<8x128xf32>
      %286 = math.exp %285 : vector<8x128xf32>
      %cst_59 = arith.constant 1.000000e+00 : f32
      %287 = vector.broadcast %cst_59 : f32 to vector<8x128xf32>
      %288 = arith.addf %287, %286 : vector<8x128xf32>
      %289 = arith.divf %287, %288 : vector<8x128xf32>
      %290 = vector.extract_strided_slice %280 {offsets = [0, 128], sizes = [8, 128], strides = [1, 1]} : vector<8x384xf32> to vector<8x128xf32>
      %291 = vector.extract_strided_slice %281 {offsets = [0, 128], sizes = [8, 128], strides = [1, 1]} : vector<8x384xf32> to vector<8x128xf32>
      %292 = arith.addf %290, %291 : vector<8x128xf32>
      %293 = arith.negf %292 : vector<8x128xf32>
      %294 = math.exp %293 : vector<8x128xf32>
      %cst_60 = arith.constant 1.000000e+00 : f32
      %295 = vector.broadcast %cst_60 : f32 to vector<8x128xf32>
      %296 = arith.addf %295, %294 : vector<8x128xf32>
      %297 = arith.divf %295, %296 : vector<8x128xf32>
      %298 = vector.extract_strided_slice %280 {offsets = [0, 256], sizes = [8, 128], strides = [1, 1]} : vector<8x384xf32> to vector<8x128xf32>
      %299 = vector.extract_strided_slice %281 {offsets = [0, 256], sizes = [8, 128], strides = [1, 1]} : vector<8x384xf32> to vector<8x128xf32>
      %300 = arith.addf %299, %23 : vector<8x128xf32>
      %301 = arith.mulf %289, %300 : vector<8x128xf32>
      %302 = arith.addf %298, %301 : vector<8x128xf32>
      %303 = math.tanh %302 : vector<8x128xf32>
      %304 = arith.subf %276, %303 : vector<8x128xf32>
      %305 = arith.mulf %297, %304 : vector<8x128xf32>
      %306 = arith.addf %303, %305 : vector<8x128xf32>
      %307 = arith.addi %0, %c7_i32 : i32
      %308 = vector.broadcast %307 : i32 to vector<8x1xi32>
      %309 = arith.cmpi slt, %308, %19 : vector<8x1xi32>
      %310 = vector.shape_cast %309 : vector<8x1xi1> to vector<8x1xi1>
      %311 = vector.broadcast %310 : vector<8x1xi1> to vector<8x128xi1>
      %312 = arith.select %311, %306, %276 : vector<8x128xi1>, vector<8x128xf32>
      %c8_i32_61 = arith.constant 8 : i32
      %c0_62 = arith.constant 0 : index
      %c0_63 = arith.constant 0 : index
      %313 = vector.load %arg11[%c0_62, %c0_63] : memref<8x128xf32, #tpu.memory_space<vmem>>, vector<8x128xf32>
      tpu.vector_store %arg11[%c0_62, %c0_63], %312 {strides = array<i32>} : memref<8x128xf32, #tpu.memory_space<vmem>>, vector<8x128xf32>,
    } else {
    }
    %c0_i32_2 = arith.constant 0 : i32
    %8 = arith.cmpi eq, %arg1, %c0_i32_2 : i32
    %9 = arith.extui %8 : i1 to i32
    %c0_i32_3 = arith.constant 0 : i32
    %10 = arith.cmpi ne, %9, %c0_i32_3 : i32
    scf.if %10 {
      %c0 = arith.constant 0 : index
      %c0_4 = arith.constant 0 : index
      %11 = vector.load %arg11[%c0, %c0_4] : memref<8x128xf32, #tpu.memory_space<vmem>>, vector<8x128xf32>
      %c0_5 = arith.constant 0 : index
      %c0_6 = arith.constant 0 : index
      %12 = vector.load %arg9[%c0_5, %c0_6] : memref<8x128xf32, #tpu.memory_space<vmem>>, vector<8x128xf32>
      tpu.vector_store %arg9[%c0_5, %c0_6], %11 {strides = array<i32>} : memref<8x128xf32, #tpu.memory_space<vmem>>, vector<8x128xf32>,
    } else {
    }
    return
  }
  func.func @transform_0(%arg0: i32, %arg1: i32, %arg2: memref<2xi32, #tpu.memory_space<smem>>) -> (i32, i32, i32) {
    %c0 = arith.constant 0 : index
    %0 = memref.load %arg2[%c0] : memref<2xi32, #tpu.memory_space<smem>>
    %1 = arith.minsi %arg1, %0 : i32
    %c0_i32 = arith.constant 0 : i32
    %c0_i32_0 = arith.constant 0 : i32
    return %arg0, %1, %c0_i32 : i32, i32, i32
  }
  func.func @transform_1(%arg0: i32, %arg1: i32, %arg2: memref<2xi32, #tpu.memory_space<smem>>) -> (i32, i32) {
    %c0_i32 = arith.constant 0 : i32
    %c0_i32_0 = arith.constant 0 : i32
    return %arg0, %c0_i32 : i32, i32
  }
  func.func @transform_2(%arg0: i32, %arg1: i32, %arg2: memref<2xi32, #tpu.memory_space<smem>>) -> (i32, i32) {
    %c0_i32 = arith.constant 0 : i32
    %c0_i32_0 = arith.constant 0 : i32
    %c0_i32_1 = arith.constant 0 : i32
    return %c0_i32, %c0_i32_0 : i32, i32
  }
  func.func @transform_3(%arg0: i32, %arg1: i32, %arg2: memref<2xi32, #tpu.memory_space<smem>>) -> (i32, i32) {
    %c0_i32 = arith.constant 0 : i32
    %c0_i32_0 = arith.constant 0 : i32
    %c0_i32_1 = arith.constant 0 : i32
    return %c0_i32, %c0_i32_0 : i32, i32
  }
  func.func @transform_4(%arg0: i32, %arg1: i32, %arg2: memref<2xi32, #tpu.memory_space<smem>>) -> (i32, i32) {
    %c0_i32 = arith.constant 0 : i32
    %c0_i32_0 = arith.constant 0 : i32
    %c0_i32_1 = arith.constant 0 : i32
    return %c0_i32, %c0_i32_0 : i32, i32
  }
  func.func @transform_5(%arg0: i32, %arg1: i32, %arg2: memref<2xi32, #tpu.memory_space<smem>>) -> (i32, i32) {
    %c0_i32 = arith.constant 0 : i32
    %c0_i32_0 = arith.constant 0 : i32
    %c0_i32_1 = arith.constant 0 : i32
    return %c0_i32, %c0_i32_0 : i32, i32
  }
  func.func @transform_6(%arg0: i32, %arg1: i32, %arg2: memref<2xi32, #tpu.memory_space<smem>>) -> (i32, i32) {
    %c0_i32 = arith.constant 0 : i32
    %c0_i32_0 = arith.constant 0 : i32
    return %arg0, %c0_i32 : i32, i32
  }
}

</mosaic_0001>

<bundles_post_ra>
// kernel: instruction_encoder_forward.1
= control target key start
LH: loop header
LB: loop body
LE: loop exit
PB: predicated region body
PF: predicated region fallthrough
CT: control target
= control target key end

     0   :  { %s3597_s0 = inlined_call_operand.vmem [shape: s32[2], index: 0, kind: input, shape index: {}]   ;;  %s3598_s1 = inlined_call_operand.vmem [shape: f32[1,64,32], index: 1, kind: input, shape index: {}]   ;;  %s3599_s2 = inlined_call_operand.vmem [shape: s32[8,1], index: 2, kind: input, shape index: {}]   ;;  %s3600_s3 = inlined_call_operand.vmem [shape: f32[32,384], index: 3, kind: input, shape index: {}]   ;;  %s3601_s4 = inlined_call_operand.vmem [shape: f32[1,384], index: 4, kind: input, shape index: {}]   ;;  %s3602_s5 = inlined_call_operand.hbm [shape: f32[128,384], index: 5, kind: input, shape index: {}]   ;;  %s3603_s6 = inlined_call_operand.vmem [shape: f32[1,128], index: 6, kind: input, shape index: {}]   ;;  %s3604_s7 = inlined_call_operand.vmem [shape: f32[8,128], index: 7, kind: output, shape index: {}]  }
   0x1   :  { %s12_s26 = sshll.u32 %s3597_s0, 4  ;;  %s13_s26 = int_to_ptr.vmem [resolvable:$true] %s12_s26 }
   0x2   :  { %s2969_s27 = scalar_lea.vmem %s13_s26, 16  ;;  %p2974_p1 = scmp.lt.s32.totalorder %s13_s26, %s13_s26 }
   0x3   :  { %p2970_p0 = scmp.ne.s32.totalorder %s13_s26, %s2969_s27  ;;  %p2975_p2 = scmp.lt.s32.totalorder %s2969_s27, %s2969_s27 }
   0x5   :  { %p2976_p3 = por %p2975_p2, %p2974_p1 }
   0x7   :  { %p2977_p4 = pnand %p2976_p3, %p2970_p0 }
   0x9   :  { %2980 = shalt.err (!%p2977_p4)  }
   0xa   :  { %s3007_s28 = smov [#allocation5]  }
   0xb   :  { %15 = dma.vmem_to_smem %s13_s26, 16, %s3007_s28, [#allocation4] }
   0xc   :  { %3003 = dma.done.wait [#allocation4], 16 }
   0xd   :  { %3004 = vsyncadd [#allocation4], 4294967280 }
   0xe   :  { %17 = sfence }
   0xf   :  { %18 = vsyncpa [#allocation7], 0  ;;  %s3008_s29 = smov [#allocation6]   ;;  %s2981_s0 = scalar_lea.hbm %s3602_s5, 6144 }
  0x10   :  { %s44_s30 = sshll.u32 %s3008_s29, 4  ;;  %p2982_p5 = scmp.ne.s32.totalorder %s3602_s5, %s2981_s0  ;;  %s45_s30 = int_to_ptr.vmem [resolvable:$true] %s44_s30 }
  0x11   :  { %p2985_p6 = scmp.lt.u32.totalorder %s2981_s0, %s3602_s5 }
  0x13   :  { %p2987_p7 = pnand %p2985_p6, %p2982_p5 }
  0x15   :  { %2990 = shalt.err (!%p2987_p7)
}
  0x16   :  { %s2991_s14 = scalar_lea.vmem %s45_s30, 6144  ;;  %p2996_p9 = scmp.lt.s32.totalorder %s45_s30, %s45_s30 }
  0x17   :  { %p2992_p8 = scmp.ne.s32.totalorder %s45_s30, %s2991_s14  ;;  %p2997_p10 = scmp.lt.s32.totalorder %s2991_s14, %s2991_s14 }
  0x19   :  { %p2998_p11 = por %p2997_p10, %p2996_p9 }
  0x1b   :  { %p2999_p12 = pnand %p2998_p11, %p2992_p8 }
  0x1d   :  { %3002 = shalt.err (!%p2999_p12)
}
  0x1e   :  { %s3009_s15 = smov 384   ;;  %s3010_s16 = smov 24  }
  0x1f   :  { %50 = dma.hbm_to_vmem [thread:$0]  %s3602_s5, 6144, %s45_s30, [#allocation7], %s3009_s15, %s3009_s15, %s3010_s16  }
  0x20   :  { %3005 = dma.done.wait [#allocation7], 6144  }
  0x21   :  { %3006 = vsyncadd [#allocation7], 4294961152  ;;  %s64_s19 = sld [smem:[#allocation5]]  ;;  %s1890_s20 = sld [smem:[#allocation5 + $0x1]]  ;;  %v3011_v0 = vmov 0.0  }
  0x22   :  { %82 = vst [vmem:[#allocation3] sm:$0xff] %v3011_v0 }
  0x27   :  { %p1887_p13 = scmp.gt.s32.totalorder %s64_s19, 0  ;;  %p1892_p1 = scmp.le.s32.totalorder %s1890_s20, 0 }
  0x28   :  { %v96_v1 = vld [vmem:[%s3600_s3 + $0x8] sm:$0xff] (!%p1892_p1)  ;;  %v99_v2 = vld [vmem:[%s3600_s3 + $0x20] sm:$0xff] (!%p1892_p1)  ;;  %v98_v5 = vld [vmem:[%s3600_s3 + $0x18] sm:$0xff] (!%p1892_p1)  ;;  %v3012_v8 = vmov (!%p1892_p1), 0.0   ;;  %vm124_vm0 = vcmask (!%p1892_p1), 261120   ;;  %v3013_v14 = vmov (!%p1892_p1), 0  }
  0x29   :  { %s3606_s19 = smov (%p1887_p13, %s64_s19), 0  ;;  %86 = sbr.rel (%p1892_p1) target bundleno = 2181 (0x885), region = 37 }
  0x2a   :  { %s1888_s21 = sshll.u32 %s3606_s19, 3  ;;  %v95_v3 = vld [vmem:[%s3600_s3] sm:$0xff] (!%p1892_p1)  ;;  %v2382_v4 = vpack.c.bf16 (!%p1892_p1), %v99_v2, %v96_v1  ;;  %v102_v6 = vld [vmem:[%s3600_s3 + $0x38] sm:$0xff] (!%p1892_p1)  ;;  %v105_v7 = vld [vmem:[%s3600_s3 + $0x50] sm:$0xff] (!%p1892_p1)  ;;  %213 = vmatprep.mubr.f32.mxu0 (!%p1892_p1), %v3012_v8  ;;  %2887 = vset.pattern.permute.xlu0 (!%p1892_p1), %v3013_v14  ;;  %v3014_v59 = vmov (!%p1892_p1), 0.0|0.0   ;;  %vm3015_vm5 = vmmov (!%p1892_p1), 0  }
  0x2b   :  { %p68_p0 = scmp.lt.s32.totalorder %s1888_s21, 7  ;;  %v2384_v9 = vpack.c.bf16 (!%p1892_p1), %v98_v5, %v95_v3  ;;  %v2386_v10 = vpack.c.bf16 (!%p1892_p1), %v105_v7, %v102_v6  ;;  %v101_v11 = vld [vmem:[%s3600_s3 + $0x30] sm:$0xff] (!%p1892_p1)  ;;  %v104_v12 = vld [vmem:[%s3600_s3 + $0x48] sm:$0xff] (!%p1892_p1)  ;;  %2888 = vset.pattern.permute.xlu1 (!%p1892_p1), %v3013_v14  ;;  %v395_v20 = vld [vmem:[#allocation6 + $0x18] sm:$0xff] (!%p1892_p1) }
  0x2c   :  { %2383 = vmatprep.subr.bf16.mxu0 (!%p1892_p1), %v2382_v4  ;;  %v393_v15 = vld [vmem:[#allocation6 + $0x8] sm:$0xff] (!%p1892_p1)  ;;  %v396_v16 = vld [vmem:[#allocation6 + $0x20] sm:$0xff] (!%p1892_p1)  ;;  %v2388_v17 = vpack.c.bf16 (!%p1892_p1), %v104_v12, %v101_v11  ;;  %v399_v21 = vld [vmem:[#allocation6 + $0x38] sm:$0xff] (!%p1892_p1) }
  0x2d   :  { %s3608_s21 = smov (!%p68_p0, %s1888_s21), 7  ;;  %2385 = vmatpush1.bf16.msra.mxu0 (!%p1892_p1), %v2384_v9  ;;  %v3105_v18 = vpack.c.bf16 (!%p1892_p1), %v396_v16, %v393_v15  ;;  %v392_v19 = vld [vmem:[#allocation6] sm:$0xff] (!%p1892_p1)  ;;  %v402_v22 = vld [vmem:[#allocation6 + $0x50] sm:$0xff] (!%p1892_p1)  ;;  %v401_v26 = vld [vmem:[#allocation6 + $0x48] sm:$0xff] (!%p1892_p1) }
  0x2e   :  { %s1889_s22 = sshll.u32 %s3608_s21, 3  ;;  %2387 = vmatprep.subr.bf16.mxu0 (!%p1892_p1), %v2386_v10  ;;  %v3107_v23 = vpack.c.bf16 (!%p1892_p1), %v395_v20, %v392_v19  ;;  %v3110_v24 = vpack.c.bf16 (!%p1892_p1), %v402_v22, %v399_v21  ;;  %v398_v25 = vld [vmem:[#allocation6 + $0x30] sm:$0xff] (!%p1892_p1)  ;;  %v405_v27 = vld [vmem:[#allocation6 + $0x68] sm:$0xff] (!%p1892_p1)  ;;  %v408_v28 = vld [vmem:[#allocation6 + $0x80] sm:$0xff] (!%p1892_p1) }
  0x2f   :  { %s3074_s25 = scalar_lea.vmem %s3598_s1, %s1889_s22  ;;  %v97_v29 = vld [vmem:[%s3600_s3 + $0x10] sm:$0xff] (!%p1892_p1)  ;;  %v100_v30 = vld [vmem:[%s3600_s3 + $0x28] sm:$0xff] (!%p1892_p1)  ;;  %v3122_v32 = vpack.c.bf16 (!%p1892_p1), %v401_v26, %v398_v25  ;;  %v3125_v35 = vpack.c.bf16 (!%p1892_p1), %v408_v28, %v405_v27  ;;  %v407_v36 = vld [vmem:[#allocation6 + $0x78] sm:$0xff] (!%p1892_p1) }
  0x30   :  { %v87_v13 = vld [vmem:[%s3074_s25] sm:$0xff]  ;;  %v88_v31 = vld [vmem:[%s3074_s25 + $0x8] sm:$0xff]  ;;  %v2390_v34 = vpack.c.bf16 %v100_v30, %v97_v29  ;;  %v106_v38 = vld [vmem:[%s3600_s3 + $0x58] sm:$0xff] }
  0x31   :  { %2090 = vmatprep.mubr.msk.f32.mxu1 %vm124_vm0, %v87_v13  ;;  %2389 = vmatpush1.bf16.msra.mxu0 %v2388_v17  ;;  %v404_v33 = vld [vmem:[#allocation6 + $0x60] sm:$0xff]  ;;  %v103_v37 = vld [vmem:[%s3600_s3 + $0x40] sm:$0xff]  ;;  %v414_v40 = vld [vmem:[#allocation6 + $0xb0] sm:$0xff] }
  0x32   :  { %2399 = vmatprep.subr.bf16.mxu0 %v3105_v18  ;;  %v411_v39 = vld [vmem:[#allocation6 + $0x98] sm:$0xff]  ;;  %2391 = vmatprep.subr.bf16.mxu1 %v2390_v34  ;;  %v2394_v41 = vpack.c.bf16 %v106_v38, %v103_v37  ;;  %v89_v42 = vld [vmem:[%s3074_s25 + $0x10] sm:$0xff]  ;;  %v3137_v43 = vpack.c.bf16 %v407_v36, %v404_v33  ;;  %v394_v44 = vld [vmem:[#allocation6 + $0x10] sm:$0xff] }
  0x33   :  { %2393 = vmatpush3.bf16.msra.mxu1 %v2390_v34  ;;  %v397_v45 = vld [vmem:[#allocation6 + $0x28] sm:$0xff]  ;;  %v3140_v46 = vpack.c.bf16 %v414_v40, %v411_v39  ;;  %v410_v47 = vld [vmem:[#allocation6 + $0x90] sm:$0xff]  ;;  %v420_v50 = vld [vmem:[#allocation6 + $0xe0] sm:$0xff] }
  0x34   :  { %1893 = vmatmul.mubr.msk.f32.vlgmr.msra.gmra.mrb[0].mxu0 %vm124_vm0, %v87_v13  ;;  %v413_v48 = vld [vmem:[#allocation6 + $0xa8] sm:$0xff]  ;;  %2395 = vmatprep.subr.bf16.mxu1 %v2394_v41  ;;  %v3143_v51 = vpack.c.bf16 %v397_v45, %v394_v44  ;;  %v90_v52 = vld [vmem:[%s3074_s25 + $0x18] sm:$0xff]  ;;  %v400_v54 = vld [vmem:[#allocation6 + $0x40] sm:$0xff] }
  0x35   :  { %2401 = vmatpush1.bf16.msra.mxu0 %v3107_v23  ;;  %219 = vmatprep.mubr.f32.mxu0 %v3012_v8  ;;  %v417_v49 = vld [vmem:[#allocation6 + $0xc8] sm:$0xff]  ;;  %v3148_v53 = vpack.c.bf16 %v413_v48, %v410_v47  ;;  %v403_v55 = vld [vmem:[#allocation6 + $0x58] sm:$0xff]  ;;  %v416_v57 = vld [vmem:[#allocation6 + $0xc0] sm:$0xff] }
  0x36   :  { %2403 = vmatprep.subr.bf16.mxu0 %v3110_v24  ;;  %v3151_v56 = vpack.c.bf16 %v420_v50, %v417_v49  ;;  %v419_v58 = vld [vmem:[#allocation6 + $0xd8] sm:$0xff]  ;;  %v426_v61 = vld [vmem:[#allocation6 + $0x110] sm:$0xff]  ;;  %v3157_v62 = vpack.c.bf16 %v403_v55, %v400_v54  ;;  %v409_v3 = vld [vmem:[#allocation6 + $0x88] sm:$0xff]  ;;  %v109_v55 = vlaneseq }
  0x37   :  { %2397 = vmatpush3.bf16.msra.mxu1 %v2394_v41  ;;  %v423_v60 = vld [vmem:[#allocation6 + $0xf8] sm:$0xff]  ;;  %v3167_v1 = vpack.c.bf16 %v419_v58, %v416_v57  ;;  %v406_v2 = vld [vmem:[#allocation6 + $0x70] sm:$0xff]  ;;  %v425_v6 = vld [vmem:[#allocation6 + $0x108] sm:$0xff] }
  0x38   :  { %1894 = vmatmul.mubr.msk.f32.gmra.mrb[2].mxu0 %vm124_vm0, %v88_v31  ;;  %2430 = vmatprep.subr.bf16.mxu1 %v3014_v59  ;;  %v3162_v63 = vld [vmem:[%s3599_s2] sm:$0xff]  ;;  %v3172_v4 = vpack.c.bf16 %v426_v61, %v423_v60  ;;  %v422_v5 = vld [vmem:[#allocation6 + $0xf0] sm:$0xff]  ;;  %v429_v9 = vld [vmem:[#allocation6 + $0x128] sm:$0xff]  ;;  %v3179_v11 = vpack.c.bf16 %v409_v3, %v406_v2  ;;  %v110_v57 = vshrl.u32 %v109_v55, 7 }
  0x39   :  { %2405 = vmatpush1.bf16.msra.mxu0 %v3122_v32  ;;  %225 = vmatprep.mubr.f32.mxu0 %v3012_v8  ;;  %v91_v0 = vld [vmem:[%s3074_s25 + $0x20] sm:$0xff]  ;;  %vm1912_vm1 = vcmp.gt.s32.totalorder %v3162_v63, 0  ;;  %vm1915_vm2 = vcmp.gt.s32.totalorder %v3162_v63, 1  ;;  %v432_v10 = vld [vmem:[#allocation6 + $0x140] sm:$0xff]  ;;  %v3185_v15 = vpack.c.bf16 %v425_v6, %v422_v5  ;;  %vm1924_vm3 = vcmp.gt.s32.totalorder %v3162_v63, 4  ;;  %v438_v25 = vld [vmem:[#allocation6 + $0x170] sm:$0xff] }
  0x3a   :  { %2407 = vmatprep.subr.bf16.mxu0 %v3125_v35  ;;  %2091 = vmatmul.mubr.msk.f32.vlgmr.msra.gmra.mrb[0].mxu1 %vm124_vm0, %v88_v31  ;;  %v618_v7 = vsel %vm1912_vm1, 1, %v3013_v14  ;;  %v795_v12 = vsel %vm1915_vm2, 1, %v3013_v14  ;;  %v92_v13 = vld [vmem:[%s3074_s25 + $0x28] sm:$0xff]  ;;  %v415_v17 = vld [vmem:[#allocation6 + $0xb8] sm:$0xff]  ;;  %v3189_v19 = vpack.c.bf16 %v432_v10, %v429_v9  ;;  %v1326_v27 = vsel %vm1924_vm3, 1, %v3013_v14  ;;  %v93_v28 = vld [vmem:[%s3074_s25 + $0x30] sm:$0xff] }
  0x3b   :  { %2432 = vmatpush3.bf16.msra.mxu1 %v3143_v51  ;;  %2093 = vmatprep.mubr.msk.f32.mxu1 %vm124_vm0, %v89_v42  ;;  %v412_v16 = vld [vmem:[#allocation6 + $0xa0] sm:$0xff]  ;;  %v431_v21 = vld [vmem:[#allocation6 + $0x138] sm:$0xff]  ;;  %v418_v30 = vld [vmem:[#allocation6 + $0xd0] sm:$0xff]  ;;  %vm1930_vm4 = vcmp.gt.s32.totalorder %v3162_v63, 6  ;;  %v119_v58 = vsub.s32 2, %v110_v57  ;;  %v111_v10 = vsub.s32 0, %v110_v57 }
  0x3c   :  { %1895 = vmatmul.mubr.msk.f32.gmra.mrb[4].mxu0 %vm124_vm0, %v89_v42  ;;  %2433 = vmatprep.subr.bf16.mxu1 %v3014_v59  ;;  %v428_v20 = vld [vmem:[#allocation6 + $0x120] sm:$0xff]  ;;  %v435_v22 = vld [vmem:[#allocation6 + $0x158] sm:$0xff]  ;;  %v3195_v26 = vpack.c.bf16 %v415_v17, %v412_v16  ;;  %v421_v31 = vld [vmem:[#allocation6 + $0xe8] sm:$0xff]  ;;  %v1680_v38 = vsel %vm1930_vm4, 1, %v3013_v14  ;;  %vm1918_vm7 = vcmp.gt.s32.totalorder %v3162_v63, 2  ;;  %vm1921_vm8 = vcmp.gt.s32.totalorder %v3162_v63, 3 }
  0x3d   :  { %2409 = vmatpush1.bf16.msra.mxu0 %v3137_v43  ;;  %231 = vmatprep.mubr.f32.mxu0 %v3012_v8  ;;  %v3201_v29 = vpack.c.bf16 %v431_v21, %v428_v20  ;;  %v3205_v33 = vpack.c.bf16 %v438_v25, %v435_v22  ;;  %v434_v34 = vld [vmem:[#allocation6 + $0x150] sm:$0xff]  ;;  %v437_v36 = vld [vmem:[#allocation6 + $0x168] sm:$0xff]  ;;  %v3211_v37 = vpack.c.bf16 %v421_v31, %v418_v30  ;;  %v424_v41 = vld [vmem:[#allocation6 + $0x100] sm:$0xff]  ;;  %v115_v30 = vsub.s32 1, %v110_v57 }
  0x3e   :  { %2411 = vmatprep.subr.bf16.mxu0 %v3140_v46  ;;  %620 = vperm.xlu0 %2887, %v618_v7   ;;  %v94_v39 = vld [vmem:[%s3074_s25 + $0x38] sm:$0xff]  ;;  %v3217_v40 = vpack.c.bf16 %v437_v36, %v434_v34  ;;  %v427_v42 = vld [vmem:[#allocation6 + $0x118] sm:$0xff]  ;;  %v433_v48 = vld [vmem:[#allocation6 + $0x148] sm:$0xff]  ;;  %vm1927_vm9 = vcmp.gt.s32.totalorder %v3162_v63, 5  ;;  %vm1933_vm10 = vcmp.gt.s32.totalorder %v3162_v63, 7 }
  0x3f   :  { %2435 = vmatpush3.bf16.msra.mxu1 %v3157_v62  ;;  %v3224_v44 = vpack.c.bf16 %v427_v42, %v424_v41  ;;  %v3228_v45 = vld [vmem:[#allocation3] sm:$0xff]  ;;  %v430_v47 = vld [vmem:[#allocation6 + $0x130] sm:$0xff]  ;;  %v436_v50 = vld [vmem:[#allocation6 + $0x160] sm:$0xff] }
  0x40   :  { %1896 = vmatmul.mubr.msk.f32.gmra.mrb[6].mxu0 %vm124_vm0, %v90_v52  ;;  %2436 = vmatprep.subr.bf16.mxu1 %v3014_v59  ;;  %v3236_v49 = vpack.c.bf16 %v433_v48, %v430_v47  ;;  %v107_v60 = vld [vmem:[%s3601_s4] sm:$0x7] }
  0x41   :  { %2413 = vmatpush1.bf16.msra.mxu0 %v3148_v53  ;;  %237 = vmatprep.mubr.f32.mxu0 %v3012_v8  ;;  %v120_v61 = vrot.slane %v107_v60, %v119_v58  ;;  %v3294_v17 = vrot.slane %v107_v60, %v111_v10 }
  0x42   :  { %2415 = vmatprep.subr.bf16.mxu0 %v3151_v56  ;;  %2094 = vmatmul.mubr.msk.f32.gmra.mrb[2].mxu1 %vm124_vm0, %v90_v52  ;;  %v439_v52 = vld [vmem:[#allocation6 + $0x178] sm:$0xff] }
  0x43   :  { %797 = vperm.xlu0 %2887, %v795_v12   ;;  %2438 = vmatpush3.bf16.msra.mxu1 %v3179_v11  ;;  %v3245_v54 = vpack.c.bf16 %v439_v52, %v436_v50  ;;  %v3309_v52 = vld [vmem:[%s3603_s6] ss:$0 sm:$0xff] }
  0x44   :  { %1897 = vmatmul.mubr.msk.f32.gmra.mrb[8].mxu0 %vm124_vm0, %v91_v0  ;;  %2439 = vmatprep.subr.bf16.mxu1 %v3014_v59 }
  0x45   :  { %2417 = vmatpush1.bf16.msra.mxu0 %v3167_v1  ;;  %243 = vmatprep.mubr.f32.mxu0 %v3012_v8 }
  0x46   :  { %2419 = vmatprep.subr.bf16.mxu0 %v3172_v4  ;;  %2096 = vmatprep.mubr.msk.f32.mxu1 %vm124_vm0, %v91_v0 }
  0x47   :  { %1328 = vperm.xlu0 %2887, %v1326_v27   ;;  %2441 = vmatpush3.bf16.msra.mxu1 %v3195_v26 }
  0x48   :  { %1898 = vmatmul.mubr.msk.f32.gmra.mrb[10].mxu0 %vm124_vm0, %v92_v13  ;;  %2442 = vmatprep.subr.bf16.mxu1 %v3014_v59 }
  0x49   :  { %2421 = vmatpush1.bf16.msra.mxu0 %v3185_v15  ;;  %249 = vmatprep.mubr.f32.mxu0 %v3012_v8 }
  0x4a   :  { %2423 = vmatprep.subr.bf16.mxu0 %v3189_v19  ;;  %2097 = vmatmul.mubr.msk.f32.gmra.mrb[4].mxu1 %vm124_vm0, %v92_v13 }
  0x4b   :  { %1682 = vperm.xlu0 %2887, %v1680_v38   ;;  %2444 = vmatpush3.bf16.msra.mxu1 %v3211_v37  ;;  %v3303_v38 = vrot.slane %v107_v60, %v115_v30  ;;  %v1857_v30 = vsel %vm1933_vm10, 1, %v3013_v14 }
  0x4c   :  { %1899 = vmatmul.mubr.msk.f32.gmra.mrb[12].mxu0 %vm124_vm0, %v93_v28  ;;  %2445 = vmatprep.subr.bf16.mxu1 %v3014_v59 }
  0x4d   :  { %2425 = vmatpush1.bf16.msra.mxu0 %v3201_v29  ;;  %255 = vmatprep.mubr.f32.mxu0 %v3012_v8 }
  0x4e   :  { %2427 = vmatprep.subr.bf16.mxu0 %v3205_v33  ;;  %2099 = vmatprep.mubr.msk.f32.mxu1 %vm124_vm0, %v93_v28 }
  0x4f   :  { %2100 = vmatmul.mubr.msk.f32.gmra.mrb[6].mxu1 %vm124_vm0, %v94_v39 }
  0x50   :  { %1900 = vmatmul.mubr.msk.f32.gmra.mrb[14].mxu0 %vm124_vm0, %v94_v39  ;;  %2447 = vmatpush3.bf16.msra.mxu1 %v3224_v44 }
  0x51   :  { %2429 = vmatpush1.bf16.msra.mxu0 %v3217_v40  ;;  %518 = vmatprep.mubr.f32.mxu0 %v3012_v8 }
  0x52   :  { %2455 = vmatprep.subr.bf16.mxu0 %v3105_v18  ;;  %2448 = vmatprep.subr.bf16.mxu1 %v3014_v59 }
  0x53   :  { %2134 = vmatprep.mubr.msk.f32.mxu1 %vm3015_vm5, %v3012_v8 }
  0x54   :  { %519 = vmatmul.mubr.f32.vlgmr.msra.gmra.mrb[0].mxu0 %v3228_v45  ;;  %2450 = vmatpush3.bf16.msra.mxu1 %v3236_v49 }
  0x55   :  { %2457 = vmatpush1.bf16.msra.mxu0 %v3107_v23  ;;  %694 = vmatprep.mubr.f32.mxu0 %v3012_v8 }
  0x56   :  { %2459 = vmatprep.subr.bf16.mxu0 %v3110_v24  ;;  %2451 = vmatprep.subr.bf16.mxu1 %v3014_v59 }
  0x58   :  { %2453 = vmatpush3.bf16.msra.mxu1 %v3245_v54 }
  0x59   :  { %2461 = vmatpush1.bf16.msra.mxu0 %v3122_v32  ;;  %2486 = vmatprep.subr.bf16.mxu1 %v3014_v59 }
  0x5a   :  { %2463 = vmatprep.subr.bf16.mxu0 %v3125_v35 }
  0x5b   :  { %2135 = vmatmul.mubr.f32.vlgmr.msra.gmra.mrb[8].mxu1 %v3228_v45 }
  0x5c   :  { %2488 = vmatpush3.bf16.msra.mxu1 %v3143_v51  ;;  %2169 = vmatprep.mubr.msk.f32.mxu1 %vm3015_vm5, %v3012_v8 }
  0x5d   :  { %2465 = vmatpush1.bf16.msra.mxu0 %v3137_v43  ;;  %2489 = vmatprep.subr.bf16.mxu1 %v3014_v59 }
  0x5e   :  { %2467 = vmatprep.subr.bf16.mxu0 %v3140_v46 }
  0x60   :  { %2491 = vmatpush3.bf16.msra.mxu1 %v3157_v62 }
  0x61   :  { %2469 = vmatpush1.bf16.msra.mxu0 %v3148_v53  ;;  %2492 = vmatprep.subr.bf16.mxu1 %v3014_v59 }
  0x62   :  { %2471 = vmatprep.subr.bf16.mxu0 %v3151_v56 }
  0x64   :  { %2494 = vmatpush3.bf16.msra.mxu1 %v3179_v11 }
  0x65   :  { %2473 = vmatpush1.bf16.msra.mxu0 %v3167_v1  ;;  %2495 = vmatprep.subr.bf16.mxu1 %v3014_v59 }
  0x66   :  { %2475 = vmatprep.subr.bf16.mxu0 %v3172_v4 }
  0x68   :  { %2497 = vmatpush3.bf16.msra.mxu1 %v3195_v26 }
  0x69   :  { %2477 = vmatpush1.bf16.msra.mxu0 %v3185_v15  ;;  %2498 = vmatprep.subr.bf16.mxu1 %v3014_v59 }
  0x6a   :  { %2479 = vmatprep.subr.bf16.mxu0 %v3189_v19 }
  0x6c   :  { %2500 = vmatpush3.bf16.msra.mxu1 %v3211_v37 }
  0x6d   :  { %2481 = vmatpush1.bf16.msra.mxu0 %v3201_v29  ;;  %2501 = vmatprep.subr.bf16.mxu1 %v3014_v59 }
  0x6e   :  { %2483 = vmatprep.subr.bf16.mxu0 %v3205_v33 }
  0x70   :  { %2503 = vmatpush3.bf16.msra.mxu1 %v3224_v44 }
  0x71   :  { %2485 = vmatpush1.bf16.msra.mxu0 %v3217_v40  ;;  %2504 = vmatprep.subr.bf16.mxu1 %v3014_v59 }
  0x72   :  { %2511 = vmatprep.subr.bf16.mxu0 %v3105_v18 }
  0x74   :  { %2506 = vmatpush3.bf16.msra.mxu1 %v3236_v49 }
  0x75   :  { %2507 = vmatprep.subr.bf16.mxu1 %v3014_v59 }
  0x78   :  { %2509 = vmatpush3.bf16.msra.mxu1 %v3245_v54 }
  0x79   :  { %2542 = vmatprep.subr.bf16.mxu1 %v3014_v59 }
 0x10d   :  { %v2092_v0 = vpop.f32.mrb[0].mxu1 }
 0x10e   :  { %v3286_v2 = vadd.f32 %v2092_v0, %v120_v61  ;;  %v328_v3 = vpop.f32.mrb[1].mxu1 }
 0x10f   :  { %v329_v60 = vadd.f32 %v328_v3, %v120_v61  ;;  %v1503_v3 = vsel %vm1927_vm9, 1, %v3013_v14 }
 0x115   :  { %v2095_v5 = vpop.f32.mrb[2].mxu1 }
 0x116   :  { %v3288_v6 = vadd.f32 %v2095_v5, %v120_v61  ;;  %v338_v7 = vpop.f32.mrb[3].mxu1 }
 0x117   :  { %v3290_v9 = vadd.f32 %v338_v7, %v120_v61 }
 0x11d   :  { %v2098_v12 = vpop.f32.mrb[4].mxu1 }
 0x11e   :  { %v3292_v13 = vadd.f32 %v2098_v12, %v120_v61  ;;  %v348_v16 = vpop.f32.mrb[5].mxu1 }
 0x11f   :  { %v3296_v20 = vadd.f32 %v348_v16, %v120_v61 }
 0x122   :  { %v2101_v21 = vpop.f32.mrb[6].mxu1 }
 0x123   :  { %v3298_v25 = vadd.f32 %v2101_v21, %v120_v61  ;;  %v358_v27 = vpop.f32.mrb[7].mxu1  ;;  %v621_v21 = vpop.permute.xlu0 %620 }
 0x124   :  { %v3301_v34 = vadd.f32 %v358_v27, %v120_v61  ;;  %vm622_vm6 = vcmp.eq.s32.totalorder %v621_v21, 1  ;;  %v1149_v61 = vsel %vm1921_vm8, 1, %v3013_v14 }
 0x127   :  { %v520_v22 = vpop.f32.mrb[0].mxu0  ;;  %v798_v21 = vpop.permute.xlu0 %797 }
 0x128   :  { %v2846_v28 = vadd.f32 %v520_v22, %v3294_v17  ;;  %v522_v31 = vpop.f32.mrb[1].mxu0  ;;  %vm799_vm11 = vcmp.eq.s32.totalorder %v798_v21, 1 }
 0x129   :  { %v2847_v39 = vadd.f32 %v522_v31, %v3303_v38 }
 0x12a   :  { %v1910_v36 = vmul.f32 -1.442695, %v2846_v28 }
 0x12b   :  { %v1911_v47 = vmul.f32 -1.442695, %v2847_v39 }
 0x12c   :  { %2889 = vpow2.f32 %v1910_v36 }
 0x12d   :  { %2891 = vpow2.f32 %v1911_v47 }
 0x12e   :  { %v591_v41 = vpop.f32.mrb[8].mxu1 }
 0x12f   :  { %v2136_v42 = vpop.f32.mrb[9].mxu1  ;;  %v609_v55 = vadd.f32 %v3309_v52, %v591_v41 }
 0x136   :  { %v2890_v48 = vpop.eup %2889 }
 0x137   :  { %v599_v50 = vadd.f32 1.0, %v2890_v48  ;;  %v2892_v57 = vpop.eup %2891 }
 0x138   :  { %v606_v5 = vadd.f32 1.0, %v2892_v57 }
 0x139   :  { %2893 = vrcp.f32 %v599_v50 }
 0x143   :  { %v2894_v58 = vpop.eup %2893 }
 0x144   :  { %v610_v0 = vmul.f32 %v2894_v58, %v609_v55 }
 0x146   :  { %v611_v7 = vadd.f32 %v610_v0, %v329_v60 }
 0x148   :  { %2895 = vtanh.f32 %v611_v7 }
 0x149   :  { %2897 = vrcp.f32 %v606_v5 }
 0x152   :  { %v2896_v10 = vpop.eup %2895 }
 0x153   :  { %v613_v12 = vsub.f32 %v3228_v45, %v2896_v10  ;;  %v2898_v16 = vpop.eup %2897 }
 0x155   :  { %v614_v22 = vmul.f32 %v2898_v16, %v613_v12 }
 0x157   :  { %v615_v27 = vadd.f32 %v2896_v10, %v614_v22 }
 0x159   :  { %v3314_v28 = vsel %vm622_vm6, %v615_v27, %v3228_v45  ;;  %v972_v45 = vsel %vm1918_vm7, 1, %v3013_v14 }
 0x15a   :  { %695 = vmatmul.mubr.f32.vlgmr.msra.gmra.mrb[2].mxu0 %v3314_v28  ;;  %2170 = vmatmul.mubr.f32.vlgmr.msra.gmra.mrb[10].mxu1 %v3314_v28 }
 0x15b   :  { %2513 = vmatpush1.bf16.msra.mxu0 %v3107_v23  ;;  %2544 = vmatpush3.bf16.msra.mxu1 %v3143_v51 }
 0x15c   :  { %2515 = vmatprep.subr.bf16.mxu0 %v3110_v24  ;;  %2545 = vmatprep.subr.bf16.mxu1 %v3014_v59 }
 0x15d   :  { %871 = vmatprep.mubr.f32.mxu0 %v3012_v8  ;;  %2204 = vmatprep.mubr.msk.f32.mxu1 %vm3015_vm5, %v3012_v8 }
 0x15e   :  { %974 = vperm.xlu1 %2888, %v972_v45  }
 0x15f   :  { %2517 = vmatpush1.bf16.msra.mxu0 %v3122_v32  ;;  %2547 = vmatpush3.bf16.msra.mxu1 %v3157_v62 }
 0x160   :  { %2519 = vmatprep.subr.bf16.mxu0 %v3125_v35  ;;  %2548 = vmatprep.subr.bf16.mxu1 %v3014_v59 }
 0x162   :  { %1151 = vperm.xlu1 %2888, %v1149_v61  }
 0x163   :  { %2521 = vmatpush1.bf16.msra.mxu0 %v3137_v43  ;;  %2550 = vmatpush3.bf16.msra.mxu1 %v3179_v11 }
 0x164   :  { %2523 = vmatprep.subr.bf16.mxu0 %v3140_v46  ;;  %2551 = vmatprep.subr.bf16.mxu1 %v3014_v59 }
 0x166   :  { %1505 = vperm.xlu1 %2888, %v1503_v3  }
 0x167   :  { %2525 = vmatpush1.bf16.msra.mxu0 %v3148_v53  ;;  %2553 = vmatpush3.bf16.msra.mxu1 %v3195_v26 }
 0x168   :  { %2527 = vmatprep.subr.bf16.mxu0 %v3151_v56  ;;  %2554 = vmatprep.subr.bf16.mxu1 %v3014_v59 }
 0x16a   :  { %1859 = vperm.xlu1 %2888, %v1857_v30  }
 0x16b   :  { %2529 = vmatpush1.bf16.msra.mxu0 %v3167_v1  ;;  %2556 = vmatpush3.bf16.msra.mxu1 %v3211_v37 }
 0x16c   :  { %2531 = vmatprep.subr.bf16.mxu0 %v3172_v4  ;;  %2557 = vmatprep.subr.bf16.mxu1 %v3014_v59 }
 0x16f   :  { %2533 = vmatpush1.bf16.msra.mxu0 %v3185_v15  ;;  %2559 = vmatpush3.bf16.msra.mxu1 %v3224_v44 }
 0x170   :  { %2535 = vmatprep.subr.bf16.mxu0 %v3189_v19  ;;  %2560 = vmatprep.subr.bf16.mxu1 %v3014_v59 }
 0x173   :  { %2537 = vmatpush1.bf16.msra.mxu0 %v3201_v29  ;;  %2562 = vmatpush3.bf16.msra.mxu1 %v3236_v49 }
 0x174   :  { %2539 = vmatprep.subr.bf16.mxu0 %v3205_v33  ;;  %2563 = vmatprep.subr.bf16.mxu1 %v3014_v59 }
 0x177   :  { %2541 = vmatpush1.bf16.msra.mxu0 %v3217_v40  ;;  %2565 = vmatpush3.bf16.msra.mxu1 %v3245_v54 }
 0x178   :  { %2567 = vmatprep.subr.bf16.mxu0 %v3105_v18  ;;  %2598 = vmatprep.subr.bf16.mxu1 %v3014_v59 }
 0x22d   :  { %v696_v31 = vpop.f32.mrb[2].mxu0  ;;  %v767_v36 = vpop.f32.mrb[10].mxu1 }
 0x22e   :  { %v2848_v39 = vadd.f32 %v696_v31, %v3294_v17  ;;  %v698_v41 = vpop.f32.mrb[3].mxu0  ;;  %v2171_v42 = vpop.f32.mrb[11].mxu1  ;;  %v785_v58 = vadd.f32 %v3309_v52, %v767_v36 }
 0x22f   :  { %v2849_v48 = vadd.f32 %v698_v41, %v3303_v38 }
 0x230   :  { %v1913_v47 = vmul.f32 -1.442695, %v2848_v39 }
 0x231   :  { %v1914_v50 = vmul.f32 -1.442695, %v2849_v48 }
 0x232   :  { %2899 = vpow2.f32 %v1913_v47 }
 0x233   :  { %2901 = vpow2.f32 %v1914_v50 }
 0x23c   :  { %v2900_v55 = vpop.eup %2899 }
 0x23d   :  { %v775_v57 = vadd.f32 1.0, %v2900_v55  ;;  %v2902_v63 = vpop.eup %2901 }
 0x23e   :  { %v782_v5 = vadd.f32 1.0, %v2902_v63 }
 0x23f   :  { %2903 = vrcp.f32 %v775_v57 }
 0x249   :  { %v2904_v14 = vpop.eup %2903 }
 0x24a   :  { %v786_v60 = vmul.f32 %v2904_v14, %v785_v58 }
 0x24c   :  { %v787_v0 = vadd.f32 %v786_v60, %v3286_v2  ;;  %v975_v60 = vpop.permute.xlu1 %974 }
 0x24d   :  { %vm976_vm12 = vcmp.eq.s32.totalorder %v975_v60, 1 }
 0x24e   :  { %2905 = vtanh.f32 %v787_v0 }
 0x24f   :  { %2907 = vrcp.f32 %v782_v5 }
 0x258   :  { %v2906_v7 = vpop.eup %2905 }
 0x259   :  { %v789_v10 = vsub.f32 %v3314_v28, %v2906_v7  ;;  %v2908_v12 = vpop.eup %2907 }
 0x25b   :  { %v790_v16 = vmul.f32 %v2908_v12, %v789_v10 }
 0x25d   :  { %v791_v22 = vadd.f32 %v2906_v7, %v790_v16 }
 0x25f   :  { %v3367_v27 = vsel %vm799_vm11, %v791_v22, %v3314_v28 }
 0x260   :  { %872 = vmatmul.mubr.f32.vlgmr.msra.gmra.mrb[4].mxu0 %v3367_v27  ;;  %2205 = vmatmul.mubr.f32.vlgmr.msra.gmra.mrb[12].mxu1 %v3367_v27 }
 0x261   :  { %2569 = vmatpush1.bf16.msra.mxu0 %v3107_v23  ;;  %2600 = vmatpush3.bf16.msra.mxu1 %v3143_v51 }
 0x262   :  { %2571 = vmatprep.subr.bf16.mxu0 %v3110_v24  ;;  %2601 = vmatprep.subr.bf16.mxu1 %v3014_v59 }
 0x263   :  { %1048 = vmatprep.mubr.f32.mxu0 %v3012_v8  ;;  %2239 = vmatprep.mubr.msk.f32.mxu1 %vm3015_vm5, %v3012_v8 }
 0x265   :  { %2573 = vmatpush1.bf16.msra.mxu0 %v3122_v32  ;;  %2603 = vmatpush3.bf16.msra.mxu1 %v3157_v62 }
 0x266   :  { %2575 = vmatprep.subr.bf16.mxu0 %v3125_v35  ;;  %2604 = vmatprep.subr.bf16.mxu1 %v3014_v59 }
 0x269   :  { %2577 = vmatpush1.bf16.msra.mxu0 %v3137_v43  ;;  %2606 = vmatpush3.bf16.msra.mxu1 %v3179_v11 }
 0x26a   :  { %2579 = vmatprep.subr.bf16.mxu0 %v3140_v46  ;;  %2607 = vmatprep.subr.bf16.mxu1 %v3014_v59 }
 0x26d   :  { %2581 = vmatpush1.bf16.msra.mxu0 %v3148_v53  ;;  %2609 = vmatpush3.bf16.msra.mxu1 %v3195_v26 }
 0x26e   :  { %2583 = vmatprep.subr.bf16.mxu0 %v3151_v56  ;;  %2610 = vmatprep.subr.bf16.mxu1 %v3014_v59 }
 0x271   :  { %2585 = vmatpush1.bf16.msra.mxu0 %v3167_v1  ;;  %2612 = vmatpush3.bf16.msra.mxu1 %v3211_v37 }
 0x272   :  { %2587 = vmatprep.subr.bf16.mxu0 %v3172_v4  ;;  %2613 = vmatprep.subr.bf16.mxu1 %v3014_v59 }
 0x275   :  { %2589 = vmatpush1.bf16.msra.mxu0 %v3185_v15  ;;  %2615 = vmatpush3.bf16.msra.mxu1 %v3224_v44 }
 0x276   :  { %2591 = vmatprep.subr.bf16.mxu0 %v3189_v19  ;;  %2616 = vmatprep.subr.bf16.mxu1 %v3014_v59 }
 0x279   :  { %2593 = vmatpush1.bf16.msra.mxu0 %v3201_v29  ;;  %2618 = vmatpush3.bf16.msra.mxu1 %v3236_v49 }
 0x27a   :  { %2595 = vmatprep.subr.bf16.mxu0 %v3205_v33  ;;  %2619 = vmatprep.subr.bf16.mxu1 %v3014_v59 }
 0x27d   :  { %2597 = vmatpush1.bf16.msra.mxu0 %v3217_v40  ;;  %2621 = vmatpush3.bf16.msra.mxu1 %v3245_v54 }
 0x27e   :  { %2623 = vmatprep.subr.bf16.mxu0 %v3105_v18  ;;  %2654 = vmatprep.subr.bf16.mxu1 %v3014_v59 }
 0x333   :  { %v873_v2 = vpop.f32.mrb[4].mxu0  ;;  %v944_v28 = vpop.f32.mrb[12].mxu1 }
 0x334   :  { %v2850_v45 = vadd.f32 %v873_v2, %v3294_v17  ;;  %v875_v61 = vpop.f32.mrb[5].mxu0  ;;  %v2206_v3 = vpop.f32.mrb[13].mxu1  ;;  %v962_v47 = vadd.f32 %v3309_v52, %v944_v28 }
 0x335   :  { %v2851_v31 = vadd.f32 %v875_v61, %v3303_v38 }
 0x336   :  { %v1916_v30 = vmul.f32 -1.442695, %v2850_v45 }
 0x337   :  { %v1917_v36 = vmul.f32 -1.442695, %v2851_v31 }
 0x338   :  { %2909 = vpow2.f32 %v1916_v30 }
 0x339   :  { %2911 = vpow2.f32 %v1917_v36 }
 0x342   :  { %v2910_v39 = vpop.eup %2909 }
 0x343   :  { %v952_v41 = vadd.f32 1.0, %v2910_v39  ;;  %v2912_v42 = vpop.eup %2911 }
 0x344   :  { %v959_v57 = vadd.f32 1.0, %v2912_v42 }
 0x345   :  { %2913 = vrcp.f32 %v952_v41 }
 0x34f   :  { %v2914_v48 = vpop.eup %2913 }
 0x350   :  { %v963_v50 = vmul.f32 %v2914_v48, %v962_v47 }
 0x352   :  { %v964_v55 = vadd.f32 %v963_v50, %v3290_v9  ;;  %v1152_v50 = vpop.permute.xlu1 %1151 }
 0x353   :  { %vm1153_vm13 = vcmp.eq.s32.totalorder %v1152_v50, 1 }
 0x354   :  { %2915 = vtanh.f32 %v964_v55 }
 0x355   :  { %2917 = vrcp.f32 %v959_v57 }
 0x35e   :  { %v2916_v63 = vpop.eup %2915 }
 0x35f   :  { %v966_v58 = vsub.f32 %v3367_v27, %v2916_v63  ;;  %v2918_v14 = vpop.eup %2917 }
 0x361   :  { %v967_v0 = vmul.f32 %v2918_v14, %v966_v58 }
 0x363   :  { %v968_v5 = vadd.f32 %v2916_v63, %v967_v0 }
 0x365   :  { %v3412_v7 = vsel %vm976_vm12, %v968_v5, %v3367_v27 }
 0x366   :  { %1049 = vmatmul.mubr.f32.vlgmr.msra.gmra.mrb[6].mxu0 %v3412_v7  ;;  %2240 = vmatmul.mubr.f32.vlgmr.msra.gmra.mrb[14].mxu1 %v3412_v7 }
 0x367   :  { %2625 = vmatpush1.bf16.msra.mxu0 %v3107_v23  ;;  %2656 = vmatpush3.bf16.msra.mxu1 %v3143_v51 }
 0x368   :  { %2627 = vmatprep.subr.bf16.mxu0 %v3110_v24  ;;  %2657 = vmatprep.subr.bf16.mxu1 %v3014_v59 }
 0x369   :  { %1225 = vmatprep.mubr.f32.mxu0 %v3012_v8  ;;  %2274 = vmatprep.mubr.msk.f32.mxu1 %vm3015_vm5, %v3012_v8 }
 0x36b   :  { %2629 = vmatpush1.bf16.msra.mxu0 %v3122_v32  ;;  %2659 = vmatpush3.bf16.msra.mxu1 %v3157_v62 }
 0x36c   :  { %2631 = vmatprep.subr.bf16.mxu0 %v3125_v35  ;;  %2660 = vmatprep.subr.bf16.mxu1 %v3014_v59 }
 0x36f   :  { %2633 = vmatpush1.bf16.msra.mxu0 %v3137_v43  ;;  %2662 = vmatpush3.bf16.msra.mxu1 %v3179_v11 }
 0x370   :  { %2635 = vmatprep.subr.bf16.mxu0 %v3140_v46  ;;  %2663 = vmatprep.subr.bf16.mxu1 %v3014_v59 }
 0x373   :  { %2637 = vmatpush1.bf16.msra.mxu0 %v3148_v53  ;;  %2665 = vmatpush3.bf16.msra.mxu1 %v3195_v26 }
 0x374   :  { %2639 = vmatprep.subr.bf16.mxu0 %v3151_v56  ;;  %2666 = vmatprep.subr.bf16.mxu1 %v3014_v59 }
 0x377   :  { %2641 = vmatpush1.bf16.msra.mxu0 %v3167_v1  ;;  %2668 = vmatpush3.bf16.msra.mxu1 %v3211_v37 }
 0x378   :  { %2643 = vmatprep.subr.bf16.mxu0 %v3172_v4  ;;  %2669 = vmatprep.subr.bf16.mxu1 %v3014_v59 }
 0x37b   :  { %2645 = vmatpush1.bf16.msra.mxu0 %v3185_v15  ;;  %2671 = vmatpush3.bf16.msra.mxu1 %v3224_v44 }
 0x37c   :  { %2647 = vmatprep.subr.bf16.mxu0 %v3189_v19  ;;  %2672 = vmatprep.subr.bf16.mxu1 %v3014_v59 }
 0x37f   :  { %2649 = vmatpush1.bf16.msra.mxu0 %v3201_v29  ;;  %2674 = vmatpush3.bf16.msra.mxu1 %v3236_v49 }
 0x380   :  { %2651 = vmatprep.subr.bf16.mxu0 %v3205_v33  ;;  %2675 = vmatprep.subr.bf16.mxu1 %v3014_v59 }
 0x383   :  { %2653 = vmatpush1.bf16.msra.mxu0 %v3217_v40  ;;  %2677 = vmatpush3.bf16.msra.mxu1 %v3245_v54 }
 0x384   :  { %2679 = vmatprep.subr.bf16.mxu0 %v3105_v18  ;;  %2710 = vmatprep.subr.bf16.mxu1 %v3014_v59 }
 0x439   :  { %v1050_v9 = vpop.f32.mrb[6].mxu0  ;;  %v1121_v10 = vpop.f32.mrb[14].mxu1 }
 0x43a   :  { %v2852_v12 = vadd.f32 %v1050_v9, %v3294_v17  ;;  %v1052_v16 = vpop.f32.mrb[7].mxu0  ;;  %v2241_v21 = vpop.f32.mrb[15].mxu1  ;;  %v1139_v3 = vadd.f32 %v3309_v52, %v1121_v10 }
 0x43b   :  { %v2853_v27 = vadd.f32 %v1052_v16, %v3303_v38 }
 0x43c   :  { %v1919_v22 = vmul.f32 -1.442695, %v2852_v12 }
 0x43d   :  { %v1920_v2 = vmul.f32 -1.442695, %v2853_v27 }
 0x43e   :  { %2919 = vpow2.f32 %v1919_v22 }
 0x43f   :  { %2921 = vpow2.f32 %v1920_v2 }
 0x448   :  { %v2920_v28 = vpop.eup %2919 }
 0x449   :  { %v1129_v45 = vadd.f32 1.0, %v2920_v28  ;;  %v2922_v61 = vpop.eup %2921 }
 0x44a   :  { %v1136_v39 = vadd.f32 1.0, %v2922_v61 }
 0x44b   :  { %2923 = vrcp.f32 %v1129_v45 }
 0x455   :  { %v2924_v30 = vpop.eup %2923 }
 0x456   :  { %v1140_v31 = vmul.f32 %v2924_v30, %v1139_v3  ;;  %v1329_v30 = vpop.permute.xlu0 %1328 }
 0x457   :  { %vm1330_vm14 = vcmp.eq.s32.totalorder %v1329_v30, 1 }
 0x458   :  { %v1141_v36 = vadd.f32 %v1140_v31, %v3288_v6 }
 0x45a   :  { %2925 = vtanh.f32 %v1141_v36 }
 0x45b   :  { %2927 = vrcp.f32 %v1136_v39 }
 0x464   :  { %v2926_v41 = vpop.eup %2925 }
 0x465   :  { %v1143_v42 = vsub.f32 %v3412_v7, %v2926_v41  ;;  %v2928_v47 = vpop.eup %2927 }
 0x467   :  { %v1144_v48 = vmul.f32 %v2928_v47, %v1143_v42 }
 0x469   :  { %v1145_v55 = vadd.f32 %v2926_v41, %v1144_v48 }
 0x46b   :  { %v3457_v57 = vsel %vm1153_vm13, %v1145_v55, %v3412_v7 }
 0x46c   :  { %1226 = vmatmul.mubr.f32.vlgmr.msra.gmra.mrb[8].mxu0 %v3457_v57  ;;  %2275 = vmatmul.mubr.f32.vlgmr.msra.gmra.mrb[16].mxu1 %v3457_v57 }
 0x46d   :  { %2681 = vmatpush1.bf16.msra.mxu0 %v3107_v23  ;;  %2712 = vmatpush3.bf16.msra.mxu1 %v3143_v51 }
 0x46e   :  { %2683 = vmatprep.subr.bf16.mxu0 %v3110_v24  ;;  %2713 = vmatprep.subr.bf16.mxu1 %v3014_v59 }
 0x46f   :  { %1402 = vmatprep.mubr.f32.mxu0 %v3012_v8  ;;  %2309 = vmatprep.mubr.msk.f32.mxu1 %vm3015_vm5, %v3012_v8 }
 0x471   :  { %2685 = vmatpush1.bf16.msra.mxu0 %v3122_v32  ;;  %2715 = vmatpush3.bf16.msra.mxu1 %v3157_v62 }
 0x472   :  { %2687 = vmatprep.subr.bf16.mxu0 %v3125_v35  ;;  %2716 = vmatprep.subr.bf16.mxu1 %v3014_v59 }
 0x475   :  { %2689 = vmatpush1.bf16.msra.mxu0 %v3137_v43  ;;  %2718 = vmatpush3.bf16.msra.mxu1 %v3179_v11 }
 0x476   :  { %2691 = vmatprep.subr.bf16.mxu0 %v3140_v46  ;;  %2719 = vmatprep.subr.bf16.mxu1 %v3014_v59 }
 0x479   :  { %2693 = vmatpush1.bf16.msra.mxu0 %v3148_v53  ;;  %2721 = vmatpush3.bf16.msra.mxu1 %v3195_v26 }
 0x47a   :  { %2695 = vmatprep.subr.bf16.mxu0 %v3151_v56  ;;  %2722 = vmatprep.subr.bf16.mxu1 %v3014_v59 }
 0x47d   :  { %2697 = vmatpush1.bf16.msra.mxu0 %v3167_v1  ;;  %2724 = vmatpush3.bf16.msra.mxu1 %v3211_v37 }
 0x47e   :  { %2699 = vmatprep.subr.bf16.mxu0 %v3172_v4  ;;  %2725 = vmatprep.subr.bf16.mxu1 %v3014_v59 }
 0x481   :  { %2701 = vmatpush1.bf16.msra.mxu0 %v3185_v15  ;;  %2727 = vmatpush3.bf16.msra.mxu1 %v3224_v44 }
 0x482   :  { %2703 = vmatprep.subr.bf16.mxu0 %v3189_v19  ;;  %2728 = vmatprep.subr.bf16.mxu1 %v3014_v59 }
 0x485   :  { %2705 = vmatpush1.bf16.msra.mxu0 %v3201_v29  ;;  %2730 = vmatpush3.bf16.msra.mxu1 %v3236_v49 }
 0x486   :  { %2707 = vmatprep.subr.bf16.mxu0 %v3205_v33  ;;  %2731 = vmatprep.subr.bf16.mxu1 %v3014_v59 }
 0x489   :  { %2709 = vmatpush1.bf16.msra.mxu0 %v3217_v40  ;;  %2733 = vmatpush3.bf16.msra.mxu1 %v3245_v54 }
 0x48a   :  { %2735 = vmatprep.subr.bf16.mxu0 %v3105_v18  ;;  %2766 = vmatprep.subr.bf16.mxu1 %v3014_v59 }
 0x53f   :  { %v1227_v6 = vpop.f32.mrb[8].mxu0  ;;  %v1298_v63 = vpop.f32.mrb[16].mxu1 }
 0x540   :  { %v2854_v58 = vadd.f32 %v1227_v6, %v3294_v17  ;;  %v1229_v14 = vpop.f32.mrb[9].mxu0  ;;  %v2276_v60 = vpop.f32.mrb[17].mxu1  ;;  %v1316_v16 = vadd.f32 %v3309_v52, %v1298_v63 }
 0x541   :  { %v2855_v5 = vadd.f32 %v1229_v14, %v3303_v38 }
 0x542   :  { %v1922_v0 = vmul.f32 -1.442695, %v2854_v58 }
 0x543   :  { %v1923_v7 = vmul.f32 -1.442695, %v2855_v5 }
 0x544   :  { %2929 = vpow2.f32 %v1922_v0 }
 0x545   :  { %2931 = vpow2.f32 %v1923_v7 }
 0x54e   :  { %v2930_v9 = vpop.eup %2929 }
 0x54f   :  { %v1306_v10 = vadd.f32 1.0, %v2930_v9  ;;  %v2932_v12 = vpop.eup %2931 }
 0x550   :  { %v1313_v2 = vadd.f32 1.0, %v2932_v12  ;;  %v1506_v12 = vpop.permute.xlu1 %1505 }
 0x551   :  { %2933 = vrcp.f32 %v1306_v10  ;;  %vm1507_vm15 = vcmp.eq.s32.totalorder %v1506_v12, 1 }
 0x55b   :  { %v2934_v21 = vpop.eup %2933 }
 0x55c   :  { %v1317_v22 = vmul.f32 %v2934_v21, %v1316_v16 }
 0x55e   :  { %v1318_v27 = vadd.f32 %v1317_v22, %v3296_v20 }
 0x560   :  { %2935 = vtanh.f32 %v1318_v27 }
 0x561   :  { %2937 = vrcp.f32 %v1313_v2 }
 0x56a   :  { %v2936_v28 = vpop.eup %2935 }
 0x56b   :  { %v1320_v45 = vsub.f32 %v3457_v57, %v2936_v28  ;;  %v2938_v61 = vpop.eup %2937 }
 0x56d   :  { %v1321_v3 = vmul.f32 %v2938_v61, %v1320_v45 }
 0x56f   :  { %v1322_v31 = vadd.f32 %v2936_v28, %v1321_v3 }
 0x571   :  { %v3502_v36 = vsel %vm1330_vm14, %v1322_v31, %v3457_v57 }
 0x572   :  { %1403 = vmatmul.mubr.f32.vlgmr.msra.gmra.mrb[10].mxu0 %v3502_v36  ;;  %2310 = vmatmul.mubr.f32.vlgmr.msra.gmra.mrb[18].mxu1 %v3502_v36 }
 0x573   :  { %2737 = vmatpush1.bf16.msra.mxu0 %v3107_v23  ;;  %2768 = vmatpush3.bf16.msra.mxu1 %v3143_v51 }
 0x574   :  { %2739 = vmatprep.subr.bf16.mxu0 %v3110_v24  ;;  %2769 = vmatprep.subr.bf16.mxu1 %v3014_v59 }
 0x575   :  { %1579 = vmatprep.mubr.f32.mxu0 %v3012_v8  ;;  %2344 = vmatprep.mubr.msk.f32.mxu1 %vm3015_vm5, %v3012_v8 }
 0x577   :  { %2741 = vmatpush1.bf16.msra.mxu0 %v3122_v32  ;;  %2771 = vmatpush3.bf16.msra.mxu1 %v3157_v62 }
 0x578   :  { %2743 = vmatprep.subr.bf16.mxu0 %v3125_v35  ;;  %2772 = vmatprep.subr.bf16.mxu1 %v3014_v59 }
 0x57b   :  { %2745 = vmatpush1.bf16.msra.mxu0 %v3137_v43  ;;  %2774 = vmatpush3.bf16.msra.mxu1 %v3179_v11 }
 0x57c   :  { %2747 = vmatprep.subr.bf16.mxu0 %v3140_v46  ;;  %2775 = vmatprep.subr.bf16.mxu1 %v3014_v59 }
 0x57f   :  { %2749 = vmatpush1.bf16.msra.mxu0 %v3148_v53  ;;  %2777 = vmatpush3.bf16.msra.mxu1 %v3195_v26 }
 0x580   :  { %2751 = vmatprep.subr.bf16.mxu0 %v3151_v56  ;;  %2778 = vmatprep.subr.bf16.mxu1 %v3014_v59 }
 0x583   :  { %2753 = vmatpush1.bf16.msra.mxu0 %v3167_v1  ;;  %2780 = vmatpush3.bf16.msra.mxu1 %v3211_v37 }
 0x584   :  { %2755 = vmatprep.subr.bf16.mxu0 %v3172_v4  ;;  %2781 = vmatprep.subr.bf16.mxu1 %v3014_v59 }
 0x587   :  { %2757 = vmatpush1.bf16.msra.mxu0 %v3185_v15  ;;  %2783 = vmatpush3.bf16.msra.mxu1 %v3224_v44 }
 0x588   :  { %2759 = vmatprep.subr.bf16.mxu0 %v3189_v19  ;;  %2784 = vmatprep.subr.bf16.mxu1 %v3014_v59 }
 0x58b   :  { %2761 = vmatpush1.bf16.msra.mxu0 %v3201_v29  ;;  %2786 = vmatpush3.bf16.msra.mxu1 %v3236_v49 }
 0x58c   :  { %2763 = vmatprep.subr.bf16.mxu0 %v3205_v33  ;;  %2787 = vmatprep.subr.bf16.mxu1 %v3014_v59 }
 0x58f   :  { %2765 = vmatpush1.bf16.msra.mxu0 %v3217_v40  ;;  %2789 = vmatpush3.bf16.msra.mxu1 %v3245_v54 }
 0x590   :  { %2791 = vmatprep.subr.bf16.mxu0 %v3105_v18  ;;  %2822 = vmatprep.subr.bf16.mxu1 %v3014_v59 }
 0x645   :  { %v1404_v20 = vpop.f32.mrb[10].mxu0  ;;  %v1475_v39 = vpop.f32.mrb[18].mxu1 }
 0x646   :  { %v2856_v41 = vadd.f32 %v1404_v20, %v3294_v17  ;;  %v1406_v42 = vpop.f32.mrb[11].mxu0  ;;  %v2311_v47 = vpop.f32.mrb[19].mxu1  ;;  %v1493_v18 = vadd.f32 %v3309_v52, %v1475_v39 }
 0x647   :  { %v2857_v50 = vadd.f32 %v1406_v42, %v3303_v38  ;;  %v1860_v47 = vpop.permute.xlu1 %1859 }
 0x648   :  { %v1925_v48 = vmul.f32 -1.442695, %v2856_v41  ;;  %vm1861_vm1 = vcmp.eq.s32.totalorder %v1860_v47, 1 }
 0x649   :  { %v1926_v55 = vmul.f32 -1.442695, %v2857_v50 }
 0x64a   :  { %2939 = vpow2.f32 %v1925_v48 }
 0x64b   :  { %2941 = vpow2.f32 %v1926_v55 }
 0x654   :  { %v2940_v57 = vpop.eup %2939 }
 0x655   :  { %v1483_v6 = vadd.f32 1.0, %v2940_v57  ;;  %v2942_v63 = vpop.eup %2941 }
 0x656   :  { %v1490_v0 = vadd.f32 1.0, %v2942_v63 }
 0x657   :  { %2943 = vrcp.f32 %v1483_v6 }
 0x661   :  { %v2944_v58 = vpop.eup %2943 }
 0x662   :  { %v1494_v14 = vmul.f32 %v2944_v58, %v1493_v18 }
 0x664   :  { %v1495_v60 = vadd.f32 %v1494_v14, %v3292_v13 }
 0x666   :  { %2945 = vtanh.f32 %v1495_v60 }
 0x667   :  { %2947 = vrcp.f32 %v1490_v0 }
 0x670   :  { %v2946_v5 = vpop.eup %2945 }
 0x671   :  { %v1497_v7 = vsub.f32 %v3502_v36, %v2946_v5  ;;  %v2948_v9 = vpop.eup %2947 }
 0x673   :  { %v1498_v10 = vmul.f32 %v2948_v9, %v1497_v7 }
 0x675   :  { %v1499_v16 = vadd.f32 %v2946_v5, %v1498_v10 }
 0x677   :  { %v3547_v21 = vsel %vm1507_vm15, %v1499_v16, %v3502_v36 }
 0x678   :  { %1580 = vmatmul.mubr.f32.vlgmr.msra.gmra.mrb[12].mxu0 %v3547_v21  ;;  %2345 = vmatmul.mubr.f32.vlgmr.msra.gmra.mrb[20].mxu1 %v3547_v21 }
 0x679   :  { %2793 = vmatpush1.bf16.msra.mxu0 %v3107_v23  ;;  %2824 = vmatpush3.bf16.msra.mxu1 %v3143_v51 }
 0x67a   :  { %2795 = vmatprep.subr.bf16.mxu0 %v3110_v24  ;;  %2825 = vmatprep.subr.bf16.mxu1 %v3014_v59 }
 0x67b   :  { %1756 = vmatprep.mubr.f32.mxu0 %v3012_v8  ;;  %2379 = vmatprep.mubr.msk.f32.mxu1 %vm3015_vm5, %v3012_v8 }
 0x67d   :  { %2797 = vmatpush1.bf16.msra.mxu0 %v3122_v32  ;;  %2827 = vmatpush3.bf16.msra.mxu1 %v3157_v62 }
 0x67e   :  { %2799 = vmatprep.subr.bf16.mxu0 %v3125_v35  ;;  %2828 = vmatprep.subr.bf16.mxu1 %v3014_v59 }
 0x681   :  { %2801 = vmatpush1.bf16.msra.mxu0 %v3137_v43  ;;  %2830 = vmatpush3.bf16.msra.mxu1 %v3179_v11 }
 0x682   :  { %2803 = vmatprep.subr.bf16.mxu0 %v3140_v46  ;;  %2831 = vmatprep.subr.bf16.mxu1 %v3014_v59 }
 0x685   :  { %2805 = vmatpush1.bf16.msra.mxu0 %v3148_v53  ;;  %2833 = vmatpush3.bf16.msra.mxu1 %v3195_v26 }
 0x686   :  { %2807 = vmatprep.subr.bf16.mxu0 %v3151_v56  ;;  %2834 = vmatprep.subr.bf16.mxu1 %v3014_v59 }
 0x689   :  { %2809 = vmatpush1.bf16.msra.mxu0 %v3167_v1  ;;  %2836 = vmatpush3.bf16.msra.mxu1 %v3211_v37 }
 0x68a   :  { %2811 = vmatprep.subr.bf16.mxu0 %v3172_v4  ;;  %2837 = vmatprep.subr.bf16.mxu1 %v3014_v59 }
 0x68d   :  { %2813 = vmatpush1.bf16.msra.mxu0 %v3185_v15  ;;  %2839 = vmatpush3.bf16.msra.mxu1 %v3224_v44 }
 0x68e   :  { %2815 = vmatprep.subr.bf16.mxu0 %v3189_v19  ;;  %2840 = vmatprep.subr.bf16.mxu1 %v3014_v59 }
 0x691   :  { %2817 = vmatpush1.bf16.msra.mxu0 %v3201_v29  ;;  %2842 = vmatpush3.bf16.msra.mxu1 %v3236_v49 }
 0x692   :  { %2819 = vmatprep.subr.bf16.mxu0 %v3205_v33  ;;  %2843 = vmatprep.subr.bf16.mxu1 %v3014_v59  ;;  %v1683_v33 = vpop.permute.xlu0 %1682 }
 0x693   :  { %vm1684_vm0 = vcmp.eq.s32.totalorder %v1683_v33, 1 }
 0x695   :  { %2821 = vmatpush1.bf16.msra.mxu0 %v3217_v40  ;;  %2845 = vmatpush3.bf16.msra.mxu1 %v3245_v54 }
 0x74b   :  { %v1581_v8 = vpop.f32.mrb[12].mxu0  ;;  %v1652_v23 = vpop.f32.mrb[20].mxu1 }
 0x74c   :  { %v2858_v24 = vadd.f32 %v1581_v8, %v3294_v17  ;;  %v1583_v32 = vpop.f32.mrb[13].mxu0  ;;  %v2346_v35 = vpop.f32.mrb[21].mxu1  ;;  %v1670_v62 = vadd.f32 %v3309_v52, %v1652_v23 }
 0x74d   :  { %v2859_v46 = vadd.f32 %v1583_v32, %v3303_v38 }
 0x74e   :  { %v1928_v43 = vmul.f32 -1.442695, %v2858_v24 }
 0x74f   :  { %v1929_v51 = vmul.f32 -1.442695, %v2859_v46 }
 0x750   :  { %2949 = vpow2.f32 %v1928_v43 }
 0x751   :  { %2951 = vpow2.f32 %v1929_v51 }
 0x75a   :  { %v2950_v53 = vpop.eup %2949 }
 0x75b   :  { %v1660_v56 = vadd.f32 1.0, %v2950_v53  ;;  %v2952_v59 = vpop.eup %2951 }
 0x75c   :  { %v1667_v15 = vadd.f32 1.0, %v2952_v59 }
 0x75d   :  { %2953 = vrcp.f32 %v1660_v56 }
 0x767   :  { %v2954_v1 = vpop.eup %2953 }
 0x768   :  { %v1671_v4 = vmul.f32 %v2954_v1, %v1670_v62 }
 0x76a   :  { %v1672_v11 = vadd.f32 %v1671_v4, %v3301_v34 }
 0x76c   :  { %2955 = vtanh.f32 %v1672_v11 }
 0x76d   :  { %2957 = vrcp.f32 %v1667_v15 }
 0x776   :  { %v2956_v19 = vpop.eup %2955 }
 0x777   :  { %v1674_v26 = vsub.f32 %v3547_v21, %v2956_v19  ;;  %v2958_v29 = vpop.eup %2957 }
 0x779   :  { %v1675_v37 = vmul.f32 %v2958_v29, %v1674_v26 }
 0x77b   :  { %v1676_v40 = vadd.f32 %v2956_v19, %v1675_v37 }
 0x77d   :  { %v1685_v44 = vsel %vm1684_vm0, %v1676_v40, %v3547_v21 }
 0x77e   :  { %1757 = vmatmul.mubr.f32.vlgmr.msra.gmra.mrb[14].mxu0 %v1685_v44  ;;  %2380 = vmatmul.mubr.f32.vlgmr.msra.gmra.mrb[22].mxu1 %v1685_v44 }
 0x851   :  { %v1758_v49 = vpop.f32.mrb[14].mxu0  ;;  %v1829_v54 = vpop.f32.mrb[22].mxu1 }
 0x852   :  { %v2860_v13 = vadd.f32 %v1758_v49, %v3294_v17  ;;  %v1760_v34 = vpop.f32.mrb[15].mxu0  ;;  %v2381_v22 = vpop.f32.mrb[23].mxu1  ;;  %v1847_v30 = vadd.f32 %v3309_v52, %v1829_v54 }
 0x853   :  { %v2861_v2 = vadd.f32 %v1760_v34, %v3303_v38 }
 0x854   :  { %v1931_v27 = vmul.f32 -1.442695, %v2860_v13 }
 0x855   :  { %v1932_v28 = vmul.f32 -1.442695, %v2861_v2 }
 0x856   :  { %2959 = vpow2.f32 %v1931_v27 }
 0x857   :  { %2961 = vpow2.f32 %v1932_v28 }
 0x860   :  { %v2960_v45 = vpop.eup %2959 }
 0x861   :  { %v1837_v61 = vadd.f32 1.0, %v2960_v45  ;;  %v2962_v3 = vpop.eup %2961 }
 0x862   :  { %v1844_v39 = vadd.f32 1.0, %v2962_v3 }
 0x863   :  { %2963 = vrcp.f32 %v1837_v61 }
 0x86d   :  { %v2964_v31 = vpop.eup %2963 }
 0x86e   :  { %v1848_v36 = vmul.f32 %v2964_v31, %v1847_v30 }
 0x870   :  { %v1849_v20 = vadd.f32 %v1848_v36, %v3298_v25 }
 0x872   :  { %2965 = vtanh.f32 %v1849_v20 }
 0x873   :  { %2967 = vrcp.f32 %v1844_v39 }
 0x87c   :  { %v2966_v17 = vpop.eup %2965 }
 0x87d   :  { %v1851_v41 = vsub.f32 %v1685_v44, %v2966_v17  ;;  %v2968_v42 = vpop.eup %2967 }
 0x87f   :  { %v1852_v38 = vmul.f32 %v2968_v42, %v1851_v41 }
 0x881   :  { %v1853_v48 = vadd.f32 %v2966_v17, %v1852_v38 }
 0x883   :  { %v1862_v50 = vsel %vm1861_vm1, %v1853_v48, %v1685_v44 }
 0x884   :  { %1863 = vst [vmem:[#allocation3] sm:$0xff] %v1862_v50 }
 0x885 PF:  {}
 0x88b   :  { %v1867_v55 = vld [vmem:[#allocation3] sm:$0xff] }
 0x88c   :  { %1868 = vst [vmem:[%s3604_s7] sm:$0xff] %v1867_v55 }
 0x88d   :  { %1873 = vsyncpa [#allocation7], 1 }

</bundles_post_ra>
